<compile_context>
chip_gen: v6e
topology: v6e:2x2x1
jax: 0.10.0
libtpu: 0.0.40
codegen_flags: <defaults>
</compile_context>

<pallas_src>
import jax
import jax.numpy as jnp
from jax import lax
from jax.experimental import pallas as pl
from jax.experimental.pallas import tpu as pltpu


def _round_up(x, m):
    return ((x + m - 1) // m) * m


def _lstm_fc_kernel(x_ref, wih_ref, whh_ref, b_ref, wfc_ref, bfc_ref,
                    out_ref, xg_scr):
    """LSTM recurrence over T steps + final FC, fully VMEM-resident.

    x_ref  : (T*Bp, Ep)  bf16  time-major, batch-flattened embedded inputs
    wih_ref: (Ep, 4Hp)   bf16  input->gates (pre-transposed, gate blocks padded)
    whh_ref: (Hp, 4Hp)   bf16  hidden->gates
    b_ref  : (1, 4Hp)    f32   b_ih + b_hh (gate blocks padded)
    wfc_ref: (Hp, Vp)    bf16  final linear weight (pre-transposed)
    bfc_ref: (1, Vp)     f32   final linear bias
    out_ref: (Bp, Vp)    f32   logits (padded)
    xg_scr : (T*Bp, 4Hp) f32   all-timestep gate pre-activations
    """
    Bp = out_ref.shape[0]
    Hp = whh_ref.shape[0]
    T = x_ref.shape[0] // Bp

    # (1) Hoisted input projection: one large MXU matmul for every timestep,
    #     bias folded in here (single broadcast, not per-iteration).
    xg_scr[...] = (
        jnp.dot(x_ref[...], wih_ref[...], preferred_element_type=jnp.float32)
        + b_ref[...])

    # (2) Hoisted recurrent weight load, closed over by the loop body.
    whh = whh_ref[...]

    h0 = jnp.zeros((Bp, Hp), jnp.float32)
    c0 = jnp.zeros((Bp, Hp), jnp.float32)

    def step(t, carry):
        h_prev, c_prev = carry
        row = pl.multiple_of(t * Bp, Bp)
        # Only h @ W_hh sits on the serial critical path now.
        gates = xg_scr[pl.ds(row, Bp), :] + jnp.dot(
            h_prev.astype(whh.dtype), whh, preferred_element_type=jnp.float32)
        # Hp is a multiple of 128 -> each gate slice is vreg-lane aligned.
        i_g = jax.nn.sigmoid(gates[:, 0 * Hp:1 * Hp])
        f_g = jax.nn.sigmoid(gates[:, 1 * Hp:2 * Hp])
        g_g = jnp.tanh(gates[:, 2 * Hp:3 * Hp])
        o_g = jax.nn.sigmoid(gates[:, 3 * Hp:4 * Hp])
        c_new = f_g * c_prev + i_g * g_g
        h_new = o_g * jnp.tanh(c_new)
        return h_new, c_new

    # (3) State carried in registers; short static trip count -> full unroll.
    h_fin, _ = lax.fori_loop(0, T, step, (h0, c0), unroll=True)

    # Dropout is identity in eval mode; final Linear fused here.
    out_ref[...] = (jnp.dot(h_fin.astype(wfc_ref.dtype), wfc_ref[...],
                            preferred_element_type=jnp.float32)
                    + bfc_ref[...])


def lstm_model_forward(tokens, params):
    """Forward pass matching LSTMModel.forward (inference / eval mode)."""
    emb_table = params["embedding"]          # (V, E)
    w_ih = params["w_ih"]                    # (4H, E)  PyTorch layout, i|f|g|o
    w_hh = params["w_hh"]                    # (4H, H)
    b_ih = params["b_ih"]                    # (4H,)
    b_hh = params["b_hh"]                    # (4H,)
    w_fc = params["w_fc"]                    # (V, H)
    b_fc = params["b_fc"]                    # (V,)

    B, T = tokens.shape
    V, E = emb_table.shape
    H = w_hh.shape[1]

    # Lane/sublane-dense padded sizes (zero padding => numerics unchanged).
    Bp = _round_up(max(B, 8), 8)
    Ep = _round_up(E, 128)
    Hp = _round_up(H, 128)
    Vp = _round_up(V, 128)

    # Glue: embedding gather + time-major + pad + flatten to (T*Bp, Ep), bf16.
    x_emb = jnp.take(emb_table, tokens, axis=0)           # (B, T, E)
    x_tm = jnp.transpose(x_emb, (1, 0, 2))                # (T, B, E)
    x_pad = jnp.zeros((T, Bp, Ep), jnp.float32).at[:, :B, :E].set(
        x_tm.astype(jnp.float32))
    x_flat = x_pad.reshape(T * Bp, Ep).astype(jnp.bfloat16)

    # Weights: (4H, in) -> (in, 4*Hp) with each of the 4 gate blocks padded
    # from H to Hp so gate extraction in the kernel is 128-lane aligned.
    def pad_gate_weight(w, in_dim, in_pad):
        wt = jnp.transpose(w).reshape(in_dim, 4, H).astype(jnp.float32)
        wp = jnp.zeros((in_pad, 4, Hp), jnp.float32).at[:in_dim, :, :H].set(wt)
        return wp.reshape(in_pad, 4 * Hp)

    wih_p = pad_gate_weight(w_ih, E, Ep).astype(jnp.bfloat16)   # (Ep, 4Hp)
    whh_p = pad_gate_weight(w_hh, H, Hp).astype(jnp.bfloat16)   # (Hp, 4Hp)

    b_all = (b_ih + b_hh).reshape(4, H).astype(jnp.float32)
    b_p = jnp.zeros((4, Hp), jnp.float32).at[:, :H].set(b_all).reshape(1, 4 * Hp)

    wfc_p = (jnp.zeros((Hp, Vp), jnp.float32)
             .at[:H, :V].set(jnp.transpose(w_fc).astype(jnp.float32))
             .astype(jnp.bfloat16))                              # (Hp, Vp)
    bfc_p = jnp.zeros((1, Vp), jnp.float32).at[0, :V].set(
        b_fc.astype(jnp.float32))

    vmem_spec = pl.BlockSpec(memory_space=pltpu.MemorySpace.VMEM)

    out_p = pl.pallas_call(
        _lstm_fc_kernel,
        out_shape=jax.ShapeDtypeStruct((Bp, Vp), jnp.float32),
        in_specs=[vmem_spec] * 6,
        out_specs=vmem_spec,
        scratch_shapes=[
            pltpu.VMEM((T * Bp, 4 * Hp), jnp.float32),  # all-timestep gate preacts
        ],
    )(x_flat, wih_p, whh_p, b_p, wfc_p, bfc_p)

    return out_p[:B, :V]


def _reference_forward(tokens, params):
    """Pure-JAX f32 reference replicating the PyTorch semantics."""
    emb = jnp.take(params["embedding"], tokens, axis=0)  # (B, T, E)
    H = params["w_hh"].shape[1]
    B = tokens.shape[0]
    h = jnp.zeros((B, H), jnp.float32)
    c = jnp.zeros((B, H), jnp.float32)
    for t in range(tokens.shape[1]):
        g = (emb[:, t, :] @ params["w_ih"].T + h @ params["w_hh"].T
             + params["b_ih"] + params["b_hh"])
        i = jax.nn.sigmoid(g[:, 0 * H:1 * H])
        f = jax.nn.sigmoid(g[:, 1 * H:2 * H])
        gg = jnp.tanh(g[:, 2 * H:3 * H])
        o = jax.nn.sigmoid(g[:, 3 * H:4 * H])
        c = f * c + i * gg
        h = o * jnp.tanh(c)
    # dropout: identity (eval)
    return h @ params["w_fc"].T + params["b_fc"]


def init_params(key, vocab_size, embedding_dim, rnn_units):
    ks = jax.random.split(key, 7)
    scale = 1.0 / jnp.sqrt(rnn_units)
    return {
        "embedding": jax.random.normal(ks[0], (vocab_size, embedding_dim),
                                       jnp.float32),
        "w_ih": jax.random.uniform(ks[1], (4 * rnn_units, embedding_dim),
                                   jnp.float32, -scale, scale),
        "w_hh": jax.random.uniform(ks[2], (4 * rnn_units, rnn_units),
                                   jnp.float32, -scale, scale),
        "b_ih": jax.random.uniform(ks[3], (4 * rnn_units,),
                                   jnp.float32, -scale, scale),
        "b_hh": jax.random.uniform(ks[4], (4 * rnn_units,),
                                   jnp.float32, -scale, scale),
        "w_fc": jax.random.uniform(ks[5], (vocab_size, rnn_units),
                                   jnp.float32, -scale, scale),
        "b_fc": jax.random.uniform(ks[6], (vocab_size,),
                                   jnp.float32, -scale, scale),
    }


if __name__ == "__main__":
    VOCAB = 64
    EMBED = 32
    HIDDEN = 32
    BATCH = 2
    SEQ = 8
    # dropout_rate is irrelevant at inference (identity); kept for fidelity.

    key = jax.random.PRNGKey(0)
    k_tok, k_par = jax.random.split(key)
    tokens = jax.random.randint(k_tok, (BATCH, SEQ), 0, VOCAB, dtype=jnp.int32)
    params = init_params(k_par, VOCAB, EMBED, HIDDEN)

    out = lstm_model_forward(tokens, params)
    out = jax.block_until_ready(out)

    ref = _reference_forward(tokens, params)
    assert out.shape == (BATCH, VOCAB)
    # bf16 MXU operands (f32 accumulation) => slightly looser tolerance vs f32 ref.
    assert jnp.allclose(out, ref, rtol=2e-2, atol=2e-2), "mismatch vs reference"
    print("KERNEL_OK")
</pallas_src>

<mosaic_0001>
module attributes {stable_mosaic.version = 11 : i64} {
  func.func @_lstm_fc_kernel(%arg0: memref<64x128xbf16, #tpu.memory_space<vmem>>, %arg1: memref<128x512xbf16, #tpu.memory_space<vmem>>, %arg2: memref<128x512xbf16, #tpu.memory_space<vmem>>, %arg3: memref<1x512xf32, #tpu.memory_space<vmem>>, %arg4: memref<128x128xbf16, #tpu.memory_space<vmem>>, %arg5: memref<1x128xf32, #tpu.memory_space<vmem>>, %arg6: memref<8x128xf32, #tpu.memory_space<vmem>>, %arg7: memref<64x512xf32, #tpu.memory_space<vmem>>) attributes {dimension_semantics = [], scalar_prefetch = 0 : i64, scratch_operands = 1 : i64, tpu.core_type = #tpu.core_type<tc>} {
    %c0 = arith.constant 0 : index
    %c0_0 = arith.constant 0 : index
    %0 = vector.load %arg0[%c0, %c0_0] : memref<64x128xbf16, #tpu.memory_space<vmem>>, vector<64x128xbf16>
    %c0_1 = arith.constant 0 : index
    %c0_2 = arith.constant 0 : index
    %1 = vector.load %arg1[%c0_1, %c0_2] : memref<128x512xbf16, #tpu.memory_space<vmem>>, vector<128x512xbf16>
    %cst = arith.constant dense<0.000000e+00> : vector<64x512xf32>
    %2 = tpu.matmul %0, %1, %cst {dimension_numbers = #tpu.dot_dimension_numbers<[1], [0], [0], [1], [0, 0, 1, 1], [], []>} : vector<64x128xbf16>, vector<128x512xbf16>, vector<64x512xf32> -> vector<64x512xf32>
    %c0_3 = arith.constant 0 : index
    %c0_4 = arith.constant 0 : index
    %3 = vector.load %arg3[%c0_3, %c0_4] : memref<1x512xf32, #tpu.memory_space<vmem>>, vector<1x512xf32>
    %4 = vector.broadcast %3 : vector<1x512xf32> to vector<64x512xf32>
    %5 = arith.addf %2, %4 : vector<64x512xf32>
    %c0_5 = arith.constant 0 : index
    %c0_6 = arith.constant 0 : index
    %6 = vector.load %arg7[%c0_5, %c0_6] : memref<64x512xf32, #tpu.memory_space<vmem>>, vector<64x512xf32>
    tpu.vector_store %arg7[%c0_5, %c0_6], %5 {strides = array<i32>} : memref<64x512xf32, #tpu.memory_space<vmem>>, vector<64x512xf32>,
    %c0_7 = arith.constant 0 : index
    %c0_8 = arith.constant 0 : index
    %7 = vector.load %arg2[%c0_7, %c0_8] : memref<128x512xbf16, #tpu.memory_space<vmem>>, vector<128x512xbf16>
    %cst_9 = arith.constant 0.000000e+00 : f32
    %8 = vector.broadcast %cst_9 : f32 to vector<8x128xf32>
    %cst_10 = arith.constant 0.000000e+00 : f32
    %9 = vector.broadcast %cst_10 : f32 to vector<8x128xf32>
    %c0_i32 = arith.constant 0 : i32
    %c8_i32 = arith.constant 8 : i32
    %10 = arith.muli %c0_i32, %c8_i32 : i32
    %11 = tpu.assume_multiple %10, 8 : i32
    %12 = arith.index_cast %11 : i32 to index
    %c0_11 = arith.constant 0 : index
    %13 = vector.load %arg7[%12, %c0_11] : memref<64x512xf32, #tpu.memory_space<vmem>>, vector<8x512xf32>
    %14 = arith.truncf %8 : vector<8x128xf32> to vector<8x128xbf16>
    %cst_12 = arith.constant dense<0.000000e+00> : vector<8x512xf32>
    %15 = tpu.matmul %14, %7, %cst_12 {dimension_numbers = #tpu.dot_dimension_numbers<[1], [0], [0], [1], [0, 0, 1, 1], [], []>} : vector<8x128xbf16>, vector<128x512xbf16>, vector<8x512xf32> -> vector<8x512xf32>
    %16 = arith.addf %13, %15 : vector<8x512xf32>
    %17 = vector.extract_strided_slice %16 {offsets = [0, 0], sizes = [8, 128], strides = [1, 1]} : vector<8x512xf32> to vector<8x128xf32>
    %18 = arith.negf %17 : vector<8x128xf32>
    %19 = math.exp %18 : vector<8x128xf32>
    %cst_13 = arith.constant 1.000000e+00 : f32
    %20 = vector.broadcast %cst_13 : f32 to vector<8x128xf32>
    %21 = arith.addf %20, %19 : vector<8x128xf32>
    %22 = arith.divf %20, %21 : vector<8x128xf32>
    %23 = vector.extract_strided_slice %16 {offsets = [0, 128], sizes = [8, 128], strides = [1, 1]} : vector<8x512xf32> to vector<8x128xf32>
    %24 = arith.negf %23 : vector<8x128xf32>
    %25 = math.exp %24 : vector<8x128xf32>
    %cst_14 = arith.constant 1.000000e+00 : f32
    %26 = vector.broadcast %cst_14 : f32 to vector<8x128xf32>
    %27 = arith.addf %26, %25 : vector<8x128xf32>
    %28 = arith.divf %26, %27 : vector<8x128xf32>
    %29 = vector.extract_strided_slice %16 {offsets = [0, 256], sizes = [8, 128], strides = [1, 1]} : vector<8x512xf32> to vector<8x128xf32>
    %30 = math.tanh %29 : vector<8x128xf32>
    %31 = vector.extract_strided_slice %16 {offsets = [0, 384], sizes = [8, 128], strides = [1, 1]} : vector<8x512xf32> to vector<8x128xf32>
    %32 = arith.negf %31 : vector<8x128xf32>
    %33 = math.exp %32 : vector<8x128xf32>
    %cst_15 = arith.constant 1.000000e+00 : f32
    %34 = vector.broadcast %cst_15 : f32 to vector<8x128xf32>
    %35 = arith.addf %34, %33 : vector<8x128xf32>
    %36 = arith.divf %34, %35 : vector<8x128xf32>
    %37 = arith.mulf %28, %9 : vector<8x128xf32>
    %38 = arith.mulf %22, %30 : vector<8x128xf32>
    %39 = arith.addf %37, %38 : vector<8x128xf32>
    %40 = math.tanh %39 : vector<8x128xf32>
    %41 = arith.mulf %36, %40 : vector<8x128xf32>
    %c1_i32 = arith.constant 1 : i32
    %c8_i32_16 = arith.constant 8 : i32
    %42 = arith.muli %c1_i32, %c8_i32_16 : i32
    %43 = tpu.assume_multiple %42, 8 : i32
    %44 = arith.index_cast %43 : i32 to index
    %c0_17 = arith.constant 0 : index
    %45 = vector.load %arg7[%44, %c0_17] : memref<64x512xf32, #tpu.memory_space<vmem>>, vector<8x512xf32>
    %46 = arith.truncf %41 : vector<8x128xf32> to vector<8x128xbf16>
    %cst_18 = arith.constant dense<0.000000e+00> : vector<8x512xf32>
    %47 = tpu.matmul %46, %7, %cst_18 {dimension_numbers = #tpu.dot_dimension_numbers<[1], [0], [0], [1], [0, 0, 1, 1], [], []>} : vector<8x128xbf16>, vector<128x512xbf16>, vector<8x512xf32> -> vector<8x512xf32>
    %48 = arith.addf %45, %47 : vector<8x512xf32>
    %49 = vector.extract_strided_slice %48 {offsets = [0, 0], sizes = [8, 128], strides = [1, 1]} : vector<8x512xf32> to vector<8x128xf32>
    %50 = arith.negf %49 : vector<8x128xf32>
    %51 = math.exp %50 : vector<8x128xf32>
    %cst_19 = arith.constant 1.000000e+00 : f32
    %52 = vector.broadcast %cst_19 : f32 to vector<8x128xf32>
    %53 = arith.addf %52, %51 : vector<8x128xf32>
    %54 = arith.divf %52, %53 : vector<8x128xf32>
    %55 = vector.extract_strided_slice %48 {offsets = [0, 128], sizes = [8, 128], strides = [1, 1]} : vector<8x512xf32> to vector<8x128xf32>
    %56 = arith.negf %55 : vector<8x128xf32>
    %57 = math.exp %56 : vector<8x128xf32>
    %cst_20 = arith.constant 1.000000e+00 : f32
    %58 = vector.broadcast %cst_20 : f32 to vector<8x128xf32>
    %59 = arith.addf %58, %57 : vector<8x128xf32>
    %60 = arith.divf %58, %59 : vector<8x128xf32>
    %61 = vector.extract_strided_slice %48 {offsets = [0, 256], sizes = [8, 128], strides = [1, 1]} : vector<8x512xf32> to vector<8x128xf32>
    %62 = math.tanh %61 : vector<8x128xf32>
    %63 = vector.extract_strided_slice %48 {offsets = [0, 384], sizes = [8, 128], strides = [1, 1]} : vector<8x512xf32> to vector<8x128xf32>
    %64 = arith.negf %63 : vector<8x128xf32>
    %65 = math.exp %64 : vector<8x128xf32>
    %cst_21 = arith.constant 1.000000e+00 : f32
    %66 = vector.broadcast %cst_21 : f32 to vector<8x128xf32>
    %67 = arith.addf %66, %65 : vector<8x128xf32>
    %68 = arith.divf %66, %67 : vector<8x128xf32>
    %69 = arith.mulf %60, %39 : vector<8x128xf32>
    %70 = arith.mulf %54, %62 : vector<8x128xf32>
    %71 = arith.addf %69, %70 : vector<8x128xf32>
    %72 = math.tanh %71 : vector<8x128xf32>
    %73 = arith.mulf %68, %72 : vector<8x128xf32>
    %c2_i32 = arith.constant 2 : i32
    %c8_i32_22 = arith.constant 8 : i32
    %74 = arith.muli %c2_i32, %c8_i32_22 : i32
    %75 = tpu.assume_multiple %74, 8 : i32
    %76 = arith.index_cast %75 : i32 to index
    %c0_23 = arith.constant 0 : index
    %77 = vector.load %arg7[%76, %c0_23] : memref<64x512xf32, #tpu.memory_space<vmem>>, vector<8x512xf32>
    %78 = arith.truncf %73 : vector<8x128xf32> to vector<8x128xbf16>
    %cst_24 = arith.constant dense<0.000000e+00> : vector<8x512xf32>
    %79 = tpu.matmul %78, %7, %cst_24 {dimension_numbers = #tpu.dot_dimension_numbers<[1], [0], [0], [1], [0, 0, 1, 1], [], []>} : vector<8x128xbf16>, vector<128x512xbf16>, vector<8x512xf32> -> vector<8x512xf32>
    %80 = arith.addf %77, %79 : vector<8x512xf32>
    %81 = vector.extract_strided_slice %80 {offsets = [0, 0], sizes = [8, 128], strides = [1, 1]} : vector<8x512xf32> to vector<8x128xf32>
    %82 = arith.negf %81 : vector<8x128xf32>
    %83 = math.exp %82 : vector<8x128xf32>
    %cst_25 = arith.constant 1.000000e+00 : f32
    %84 = vector.broadcast %cst_25 : f32 to vector<8x128xf32>
    %85 = arith.addf %84, %83 : vector<8x128xf32>
    %86 = arith.divf %84, %85 : vector<8x128xf32>
    %87 = vector.extract_strided_slice %80 {offsets = [0, 128], sizes = [8, 128], strides = [1, 1]} : vector<8x512xf32> to vector<8x128xf32>
    %88 = arith.negf %87 : vector<8x128xf32>
    %89 = math.exp %88 : vector<8x128xf32>
    %cst_26 = arith.constant 1.000000e+00 : f32
    %90 = vector.broadcast %cst_26 : f32 to vector<8x128xf32>
    %91 = arith.addf %90, %89 : vector<8x128xf32>
    %92 = arith.divf %90, %91 : vector<8x128xf32>
    %93 = vector.extract_strided_slice %80 {offsets = [0, 256], sizes = [8, 128], strides = [1, 1]} : vector<8x512xf32> to vector<8x128xf32>
    %94 = math.tanh %93 : vector<8x128xf32>
    %95 = vector.extract_strided_slice %80 {offsets = [0, 384], sizes = [8, 128], strides = [1, 1]} : vector<8x512xf32> to vector<8x128xf32>
    %96 = arith.negf %95 : vector<8x128xf32>
    %97 = math.exp %96 : vector<8x128xf32>
    %cst_27 = arith.constant 1.000000e+00 : f32
    %98 = vector.broadcast %cst_27 : f32 to vector<8x128xf32>
    %99 = arith.addf %98, %97 : vector<8x128xf32>
    %100 = arith.divf %98, %99 : vector<8x128xf32>
    %101 = arith.mulf %92, %71 : vector<8x128xf32>
    %102 = arith.mulf %86, %94 : vector<8x128xf32>
    %103 = arith.addf %101, %102 : vector<8x128xf32>
    %104 = math.tanh %103 : vector<8x128xf32>
    %105 = arith.mulf %100, %104 : vector<8x128xf32>
    %c3_i32 = arith.constant 3 : i32
    %c8_i32_28 = arith.constant 8 : i32
    %106 = arith.muli %c3_i32, %c8_i32_28 : i32
    %107 = tpu.assume_multiple %106, 8 : i32
    %108 = arith.index_cast %107 : i32 to index
    %c0_29 = arith.constant 0 : index
    %109 = vector.load %arg7[%108, %c0_29] : memref<64x512xf32, #tpu.memory_space<vmem>>, vector<8x512xf32>
    %110 = arith.truncf %105 : vector<8x128xf32> to vector<8x128xbf16>
    %cst_30 = arith.constant dense<0.000000e+00> : vector<8x512xf32>
    %111 = tpu.matmul %110, %7, %cst_30 {dimension_numbers = #tpu.dot_dimension_numbers<[1], [0], [0], [1], [0, 0, 1, 1], [], []>} : vector<8x128xbf16>, vector<128x512xbf16>, vector<8x512xf32> -> vector<8x512xf32>
    %112 = arith.addf %109, %111 : vector<8x512xf32>
    %113 = vector.extract_strided_slice %112 {offsets = [0, 0], sizes = [8, 128], strides = [1, 1]} : vector<8x512xf32> to vector<8x128xf32>
    %114 = arith.negf %113 : vector<8x128xf32>
    %115 = math.exp %114 : vector<8x128xf32>
    %cst_31 = arith.constant 1.000000e+00 : f32
    %116 = vector.broadcast %cst_31 : f32 to vector<8x128xf32>
    %117 = arith.addf %116, %115 : vector<8x128xf32>
    %118 = arith.divf %116, %117 : vector<8x128xf32>
    %119 = vector.extract_strided_slice %112 {offsets = [0, 128], sizes = [8, 128], strides = [1, 1]} : vector<8x512xf32> to vector<8x128xf32>
    %120 = arith.negf %119 : vector<8x128xf32>
    %121 = math.exp %120 : vector<8x128xf32>
    %cst_32 = arith.constant 1.000000e+00 : f32
    %122 = vector.broadcast %cst_32 : f32 to vector<8x128xf32>
    %123 = arith.addf %122, %121 : vector<8x128xf32>
    %124 = arith.divf %122, %123 : vector<8x128xf32>
    %125 = vector.extract_strided_slice %112 {offsets = [0, 256], sizes = [8, 128], strides = [1, 1]} : vector<8x512xf32> to vector<8x128xf32>
    %126 = math.tanh %125 : vector<8x128xf32>
    %127 = vector.extract_strided_slice %112 {offsets = [0, 384], sizes = [8, 128], strides = [1, 1]} : vector<8x512xf32> to vector<8x128xf32>
    %128 = arith.negf %127 : vector<8x128xf32>
    %129 = math.exp %128 : vector<8x128xf32>
    %cst_33 = arith.constant 1.000000e+00 : f32
    %130 = vector.broadcast %cst_33 : f32 to vector<8x128xf32>
    %131 = arith.addf %130, %129 : vector<8x128xf32>
    %132 = arith.divf %130, %131 : vector<8x128xf32>
    %133 = arith.mulf %124, %103 : vector<8x128xf32>
    %134 = arith.mulf %118, %126 : vector<8x128xf32>
    %135 = arith.addf %133, %134 : vector<8x128xf32>
    %136 = math.tanh %135 : vector<8x128xf32>
    %137 = arith.mulf %132, %136 : vector<8x128xf32>
    %c4_i32 = arith.constant 4 : i32
    %c8_i32_34 = arith.constant 8 : i32
    %138 = arith.muli %c4_i32, %c8_i32_34 : i32
    %139 = tpu.assume_multiple %138, 8 : i32
    %140 = arith.index_cast %139 : i32 to index
    %c0_35 = arith.constant 0 : index
    %141 = vector.load %arg7[%140, %c0_35] : memref<64x512xf32, #tpu.memory_space<vmem>>, vector<8x512xf32>
    %142 = arith.truncf %137 : vector<8x128xf32> to vector<8x128xbf16>
    %cst_36 = arith.constant dense<0.000000e+00> : vector<8x512xf32>
    %143 = tpu.matmul %142, %7, %cst_36 {dimension_numbers = #tpu.dot_dimension_numbers<[1], [0], [0], [1], [0, 0, 1, 1], [], []>} : vector<8x128xbf16>, vector<128x512xbf16>, vector<8x512xf32> -> vector<8x512xf32>
    %144 = arith.addf %141, %143 : vector<8x512xf32>
    %145 = vector.extract_strided_slice %144 {offsets = [0, 0], sizes = [8, 128], strides = [1, 1]} : vector<8x512xf32> to vector<8x128xf32>
    %146 = arith.negf %145 : vector<8x128xf32>
    %147 = math.exp %146 : vector<8x128xf32>
    %cst_37 = arith.constant 1.000000e+00 : f32
    %148 = vector.broadcast %cst_37 : f32 to vector<8x128xf32>
    %149 = arith.addf %148, %147 : vector<8x128xf32>
    %150 = arith.divf %148, %149 : vector<8x128xf32>
    %151 = vector.extract_strided_slice %144 {offsets = [0, 128], sizes = [8, 128], strides = [1, 1]} : vector<8x512xf32> to vector<8x128xf32>
    %152 = arith.negf %151 : vector<8x128xf32>
    %153 = math.exp %152 : vector<8x128xf32>
    %cst_38 = arith.constant 1.000000e+00 : f32
    %154 = vector.broadcast %cst_38 : f32 to vector<8x128xf32>
    %155 = arith.addf %154, %153 : vector<8x128xf32>
    %156 = arith.divf %154, %155 : vector<8x128xf32>
    %157 = vector.extract_strided_slice %144 {offsets = [0, 256], sizes = [8, 128], strides = [1, 1]} : vector<8x512xf32> to vector<8x128xf32>
    %158 = math.tanh %157 : vector<8x128xf32>
    %159 = vector.extract_strided_slice %144 {offsets = [0, 384], sizes = [8, 128], strides = [1, 1]} : vector<8x512xf32> to vector<8x128xf32>
    %160 = arith.negf %159 : vector<8x128xf32>
    %161 = math.exp %160 : vector<8x128xf32>
    %cst_39 = arith.constant 1.000000e+00 : f32
    %162 = vector.broadcast %cst_39 : f32 to vector<8x128xf32>
    %163 = arith.addf %162, %161 : vector<8x128xf32>
    %164 = arith.divf %162, %163 : vector<8x128xf32>
    %165 = arith.mulf %156, %135 : vector<8x128xf32>
    %166 = arith.mulf %150, %158 : vector<8x128xf32>
    %167 = arith.addf %165, %166 : vector<8x128xf32>
    %168 = math.tanh %167 : vector<8x128xf32>
    %169 = arith.mulf %164, %168 : vector<8x128xf32>
    %c5_i32 = arith.constant 5 : i32
    %c8_i32_40 = arith.constant 8 : i32
    %170 = arith.muli %c5_i32, %c8_i32_40 : i32
    %171 = tpu.assume_multiple %170, 8 : i32
    %172 = arith.index_cast %171 : i32 to index
    %c0_41 = arith.constant 0 : index
    %173 = vector.load %arg7[%172, %c0_41] : memref<64x512xf32, #tpu.memory_space<vmem>>, vector<8x512xf32>
    %174 = arith.truncf %169 : vector<8x128xf32> to vector<8x128xbf16>
    %cst_42 = arith.constant dense<0.000000e+00> : vector<8x512xf32>
    %175 = tpu.matmul %174, %7, %cst_42 {dimension_numbers = #tpu.dot_dimension_numbers<[1], [0], [0], [1], [0, 0, 1, 1], [], []>} : vector<8x128xbf16>, vector<128x512xbf16>, vector<8x512xf32> -> vector<8x512xf32>
    %176 = arith.addf %173, %175 : vector<8x512xf32>
    %177 = vector.extract_strided_slice %176 {offsets = [0, 0], sizes = [8, 128], strides = [1, 1]} : vector<8x512xf32> to vector<8x128xf32>
    %178 = arith.negf %177 : vector<8x128xf32>
    %179 = math.exp %178 : vector<8x128xf32>
    %cst_43 = arith.constant 1.000000e+00 : f32
    %180 = vector.broadcast %cst_43 : f32 to vector<8x128xf32>
    %181 = arith.addf %180, %179 : vector<8x128xf32>
    %182 = arith.divf %180, %181 : vector<8x128xf32>
    %183 = vector.extract_strided_slice %176 {offsets = [0, 128], sizes = [8, 128], strides = [1, 1]} : vector<8x512xf32> to vector<8x128xf32>
    %184 = arith.negf %183 : vector<8x128xf32>
    %185 = math.exp %184 : vector<8x128xf32>
    %cst_44 = arith.constant 1.000000e+00 : f32
    %186 = vector.broadcast %cst_44 : f32 to vector<8x128xf32>
    %187 = arith.addf %186, %185 : vector<8x128xf32>
    %188 = arith.divf %186, %187 : vector<8x128xf32>
    %189 = vector.extract_strided_slice %176 {offsets = [0, 256], sizes = [8, 128], strides = [1, 1]} : vector<8x512xf32> to vector<8x128xf32>
    %190 = math.tanh %189 : vector<8x128xf32>
    %191 = vector.extract_strided_slice %176 {offsets = [0, 384], sizes = [8, 128], strides = [1, 1]} : vector<8x512xf32> to vector<8x128xf32>
    %192 = arith.negf %191 : vector<8x128xf32>
    %193 = math.exp %192 : vector<8x128xf32>
    %cst_45 = arith.constant 1.000000e+00 : f32
    %194 = vector.broadcast %cst_45 : f32 to vector<8x128xf32>
    %195 = arith.addf %194, %193 : vector<8x128xf32>
    %196 = arith.divf %194, %195 : vector<8x128xf32>
    %197 = arith.mulf %188, %167 : vector<8x128xf32>
    %198 = arith.mulf %182, %190 : vector<8x128xf32>
    %199 = arith.addf %197, %198 : vector<8x128xf32>
    %200 = math.tanh %199 : vector<8x128xf32>
    %201 = arith.mulf %196, %200 : vector<8x128xf32>
    %c6_i32 = arith.constant 6 : i32
    %c8_i32_46 = arith.constant 8 : i32
    %202 = arith.muli %c6_i32, %c8_i32_46 : i32
    %203 = tpu.assume_multiple %202, 8 : i32
    %204 = arith.index_cast %203 : i32 to index
    %c0_47 = arith.constant 0 : index
    %205 = vector.load %arg7[%204, %c0_47] : memref<64x512xf32, #tpu.memory_space<vmem>>, vector<8x512xf32>
    %206 = arith.truncf %201 : vector<8x128xf32> to vector<8x128xbf16>
    %cst_48 = arith.constant dense<0.000000e+00> : vector<8x512xf32>
    %207 = tpu.matmul %206, %7, %cst_48 {dimension_numbers = #tpu.dot_dimension_numbers<[1], [0], [0], [1], [0, 0, 1, 1], [], []>} : vector<8x128xbf16>, vector<128x512xbf16>, vector<8x512xf32> -> vector<8x512xf32>
    %208 = arith.addf %205, %207 : vector<8x512xf32>
    %209 = vector.extract_strided_slice %208 {offsets = [0, 0], sizes = [8, 128], strides = [1, 1]} : vector<8x512xf32> to vector<8x128xf32>
    %210 = arith.negf %209 : vector<8x128xf32>
    %211 = math.exp %210 : vector<8x128xf32>
    %cst_49 = arith.constant 1.000000e+00 : f32
    %212 = vector.broadcast %cst_49 : f32 to vector<8x128xf32>
    %213 = arith.addf %212, %211 : vector<8x128xf32>
    %214 = arith.divf %212, %213 : vector<8x128xf32>
    %215 = vector.extract_strided_slice %208 {offsets = [0, 128], sizes = [8, 128], strides = [1, 1]} : vector<8x512xf32> to vector<8x128xf32>
    %216 = arith.negf %215 : vector<8x128xf32>
    %217 = math.exp %216 : vector<8x128xf32>
    %cst_50 = arith.constant 1.000000e+00 : f32
    %218 = vector.broadcast %cst_50 : f32 to vector<8x128xf32>
    %219 = arith.addf %218, %217 : vector<8x128xf32>
    %220 = arith.divf %218, %219 : vector<8x128xf32>
    %221 = vector.extract_strided_slice %208 {offsets = [0, 256], sizes = [8, 128], strides = [1, 1]} : vector<8x512xf32> to vector<8x128xf32>
    %222 = math.tanh %221 : vector<8x128xf32>
    %223 = vector.extract_strided_slice %208 {offsets = [0, 384], sizes = [8, 128], strides = [1, 1]} : vector<8x512xf32> to vector<8x128xf32>
    %224 = arith.negf %223 : vector<8x128xf32>
    %225 = math.exp %224 : vector<8x128xf32>
    %cst_51 = arith.constant 1.000000e+00 : f32
    %226 = vector.broadcast %cst_51 : f32 to vector<8x128xf32>
    %227 = arith.addf %226, %225 : vector<8x128xf32>
    %228 = arith.divf %226, %227 : vector<8x128xf32>
    %229 = arith.mulf %220, %199 : vector<8x128xf32>
    %230 = arith.mulf %214, %222 : vector<8x128xf32>
    %231 = arith.addf %229, %230 : vector<8x128xf32>
    %232 = math.tanh %231 : vector<8x128xf32>
    %233 = arith.mulf %228, %232 : vector<8x128xf32>
    %c7_i32 = arith.constant 7 : i32
    %c8_i32_52 = arith.constant 8 : i32
    %234 = arith.muli %c7_i32, %c8_i32_52 : i32
    %235 = tpu.assume_multiple %234, 8 : i32
    %236 = arith.index_cast %235 : i32 to index
    %c0_53 = arith.constant 0 : index
    %237 = vector.load %arg7[%236, %c0_53] : memref<64x512xf32, #tpu.memory_space<vmem>>, vector<8x512xf32>
    %238 = arith.truncf %233 : vector<8x128xf32> to vector<8x128xbf16>
    %cst_54 = arith.constant dense<0.000000e+00> : vector<8x512xf32>
    %239 = tpu.matmul %238, %7, %cst_54 {dimension_numbers = #tpu.dot_dimension_numbers<[1], [0], [0], [1], [0, 0, 1, 1], [], []>} : vector<8x128xbf16>, vector<128x512xbf16>, vector<8x512xf32> -> vector<8x512xf32>
    %240 = arith.addf %237, %239 : vector<8x512xf32>
    %241 = vector.extract_strided_slice %240 {offsets = [0, 0], sizes = [8, 128], strides = [1, 1]} : vector<8x512xf32> to vector<8x128xf32>
    %242 = arith.negf %241 : vector<8x128xf32>
    %243 = math.exp %242 : vector<8x128xf32>
    %cst_55 = arith.constant 1.000000e+00 : f32
    %244 = vector.broadcast %cst_55 : f32 to vector<8x128xf32>
    %245 = arith.addf %244, %243 : vector<8x128xf32>
    %246 = arith.divf %244, %245 : vector<8x128xf32>
    %247 = vector.extract_strided_slice %240 {offsets = [0, 128], sizes = [8, 128], strides = [1, 1]} : vector<8x512xf32> to vector<8x128xf32>
    %248 = arith.negf %247 : vector<8x128xf32>
    %249 = math.exp %248 : vector<8x128xf32>
    %cst_56 = arith.constant 1.000000e+00 : f32
    %250 = vector.broadcast %cst_56 : f32 to vector<8x128xf32>
    %251 = arith.addf %250, %249 : vector<8x128xf32>
    %252 = arith.divf %250, %251 : vector<8x128xf32>
    %253 = vector.extract_strided_slice %240 {offsets = [0, 256], sizes = [8, 128], strides = [1, 1]} : vector<8x512xf32> to vector<8x128xf32>
    %254 = math.tanh %253 : vector<8x128xf32>
    %255 = vector.extract_strided_slice %240 {offsets = [0, 384], sizes = [8, 128], strides = [1, 1]} : vector<8x512xf32> to vector<8x128xf32>
    %256 = arith.negf %255 : vector<8x128xf32>
    %257 = math.exp %256 : vector<8x128xf32>
    %cst_57 = arith.constant 1.000000e+00 : f32
    %258 = vector.broadcast %cst_57 : f32 to vector<8x128xf32>
    %259 = arith.addf %258, %257 : vector<8x128xf32>
    %260 = arith.divf %258, %259 : vector<8x128xf32>
    %261 = arith.mulf %252, %231 : vector<8x128xf32>
    %262 = arith.mulf %246, %254 : vector<8x128xf32>
    %263 = arith.addf %261, %262 : vector<8x128xf32>
    %264 = math.tanh %263 : vector<8x128xf32>
    %265 = arith.mulf %260, %264 : vector<8x128xf32>
    %c8_i32_58 = arith.constant 8 : i32
    %266 = arith.truncf %265 : vector<8x128xf32> to vector<8x128xbf16>
    %c0_59 = arith.constant 0 : index
    %c0_60 = arith.constant 0 : index
    %267 = vector.load %arg4[%c0_59, %c0_60] : memref<128x128xbf16, #tpu.memory_space<vmem>>, vector<128x128xbf16>
    %cst_61 = arith.constant dense<0.000000e+00> : vector<8x128xf32>
    %268 = tpu.matmul %266, %267, %cst_61 {dimension_numbers = #tpu.dot_dimension_numbers<[1], [0], [0], [1], [0, 0, 1, 1], [], []>} : vector<8x128xbf16>, vector<128x128xbf16>, vector<8x128xf32> -> vector<8x128xf32>
    %c0_62 = arith.constant 0 : index
    %c0_63 = arith.constant 0 : index
    %269 = vector.load %arg5[%c0_62, %c0_63] : memref<1x128xf32, #tpu.memory_space<vmem>>, vector<1x128xf32>
    %270 = vector.broadcast %269 : vector<1x128xf32> to vector<8x128xf32>
    %271 = arith.addf %268, %270 : vector<8x128xf32>
    %c0_64 = arith.constant 0 : index
    %c0_65 = arith.constant 0 : index
    %272 = vector.load %arg6[%c0_64, %c0_65] : memref<8x128xf32, #tpu.memory_space<vmem>>, vector<8x128xf32>
    tpu.vector_store %arg6[%c0_64, %c0_65], %271 {strides = array<i32>} : memref<8x128xf32, #tpu.memory_space<vmem>>, vector<8x128xf32>,
    return
  }
}

</mosaic_0001>

<bundles_post_ra>
// kernel: tpu_custom_call.1
= control target key start
LH: loop header
LB: loop body
LE: loop exit
PB: predicated region body
PF: predicated region fallthrough
CT: control target
= control target key end

     0   :  { %11 = vsyncpa [#allocation4], 0  ;;  %s2892_s0 = inlined_call_operand.hbm [shape: bf16[64,128], index: 0, kind: input, shape index: {}]   ;;  %s2893_s1 = inlined_call_operand.hbm [shape: bf16[128,512], index: 1, kind: input, shape index: {}]   ;;  %s2894_s2 = inlined_call_operand.hbm [shape: bf16[128,512], index: 2, kind: input, shape index: {}]   ;;  %s2895_s3 = inlined_call_operand.vmem [shape: f32[1,512], index: 3, kind: input, shape index: {}]   ;;  %s2896_s4 = inlined_call_operand.hbm [shape: bf16[128,128], index: 4, kind: input, shape index: {}]   ;;  %s2897_s5 = inlined_call_operand.vmem [shape: f32[1,128], index: 5, kind: input, shape index: {}]   ;;  %s2898_s6 = inlined_call_operand.hbm [shape: f32[8,128], index: 6, kind: output, shape index: {}]  }
   0x1   :  { %12 = vsyncpa [#allocation7], 0 }
   0x2   :  { %13 = vsyncpa [#allocation10], 0 }
   0x3   :  { %14 = vsyncpa [#allocation5], 0  ;;  %s2294_s21 = smov [#allocation6]  }
   0x4   :  { %s32_s22 = sshll.u32 %s2294_s21, 4  ;;  %s33_s22 = int_to_ptr.vmem [resolvable:$true] %s32_s22 }
   0x5   :  { %s2194_s23 = scalar_lea.vmem %s33_s22, 4096  ;;  %p2199_p1 = scmp.lt.s32.totalorder %s33_s22, %s33_s22 }
   0x6   :  { %p2195_p0 = scmp.ne.s32.totalorder %s33_s22, %s2194_s23  ;;  %p2200_p2 = scmp.lt.s32.totalorder %s2194_s23, %s2194_s23 }
   0x8   :  { %p2201_p3 = por %p2200_p2, %p2199_p1 }
   0xa   :  { %p2202_p4 = pnand %p2201_p3, %p2195_p0 }
   0xc   :  { %2205 = shalt.err (!%p2202_p4)
}
   0xd   :  { %s2295_s24 = smov 256   ;;  %s2296_s25 = smov 16  }
   0xe   :  { %38 = dma.hbm_to_vmem [thread:$0]  %s2893_s1, 4096, %s33_s22, [#allocation7], %s2295_s24, %s2295_s24, %s2296_s25  }
   0xf   :  { %s2297_s28 = smov [#allocation3]  }
  0x10   :  { %s20_s29 = sshll.u32 %s2297_s28, 4  ;;  %s21_s29 = int_to_ptr.vmem [resolvable:$true] %s20_s29 }
  0x11   :  { %s2214_s30 = scalar_lea.vmem %s21_s29, 512  ;;  %p2219_p6 = scmp.lt.s32.totalorder %s21_s29, %s21_s29 }
  0x12   :  { %p2215_p5 = scmp.ne.s32.totalorder %s21_s29, %s2214_s30  ;;  %p2220_p7 = scmp.lt.s32.totalorder %s2214_s30, %s2214_s30 }
  0x14   :  { %p2221_p8 = por %p2220_p7, %p2219_p6 }
  0x16   :  { %p2222_p9 = pnand %p2221_p8, %p2215_p5 }
  0x18   :  { %2225 = shalt.err (!%p2222_p9)
}
  0x19   :  { %s2298_s7 = smov 64   ;;  %s2299_s8 = smov 4  }
  0x1a   :  { %26 = dma.hbm_to_vmem [thread:$0]  %s2892_s0, 512, %s21_s29, [#allocation4], %s2298_s7, %s2298_s7, %s2299_s8  }
  0x1b   :  { %s2300_s11 = smov [#allocation8]   ;;  %s2301_s13 = smov [#allocation9]  }
  0x1c   :  { %s44_s12 = sshll.u32 %s2300_s11, 4  ;;  %s58_s1 = sshll.u32 %s2301_s13, 4  ;;  %s45_s12 = int_to_ptr.vmem [resolvable:$true] %s44_s12  ;;  %s59_s1 = int_to_ptr.vmem [resolvable:$true] %s58_s1 }
  0x1d   :  { %s2234_s14 = scalar_lea.vmem %s45_s12, 4096  ;;  %p2239_p11 = scmp.lt.s32.totalorder %s45_s12, %s45_s12 }
  0x1e   :  { %p2235_p10 = scmp.ne.s32.totalorder %s45_s12, %s2234_s14  ;;  %p2240_p12 = scmp.lt.s32.totalorder %s2234_s14, %s2234_s14 }
  0x20   :  { %p2241_p13 = por %p2240_p12, %p2239_p11 }
  0x22   :  { %p2242_p0 = pnand %p2241_p13, %p2235_p10 }
  0x24   :  { %2245 = shalt.err (!%p2242_p0)
}
  0x25   :  { %50 = dma.hbm_to_vmem [thread:$0]  %s2894_s2, 4096, %s45_s12, [#allocation7], %s2295_s24, %s2295_s24, %s2296_s25  }
  0x26   :  { %s2254_s0 = scalar_lea.vmem %s59_s1, 1024  ;;  %p2259_p2 = scmp.lt.s32.totalorder %s59_s1, %s59_s1 }
  0x27   :  { %p2255_p1 = scmp.ne.s32.totalorder %s59_s1, %s2254_s0  ;;  %p2260_p3 = scmp.lt.s32.totalorder %s2254_s0, %s2254_s0 }
  0x29   :  { %p2261_p4 = por %p2260_p3, %p2259_p2 }
  0x2b   :  { %p2262_p5 = pnand %p2261_p4, %p2255_p1 }
  0x2d   :  { %2265 = shalt.err (!%p2262_p5)
}
  0x2e   :  { %64 = dma.hbm_to_vmem [thread:$0]  %s2896_s4, 1024, %s59_s1, [#allocation10], %s2298_s7, %s2298_s7, %s2299_s8  }
  0x2f   :  { %2286 = dma.done.wait [#allocation4], 512  }
  0x30   :  { %2287 = vsyncadd [#allocation4], 4294966784 }
  0x31   :  { %2288 = dma.done.wait [#allocation7], 8192  }
  0x32   :  { %2289 = vsyncadd [#allocation7], 4294959104 }
  0x33   :  { %2290 = dma.done.wait [#allocation10], 1024  }
  0x34   :  { %2291 = vsyncadd [#allocation10], 4294966272  ;;  %v2899_v0 = vmov 0   ;;  %v1918_v1 = vld [vmem:[#allocation6 + $0xe4] ss:$16 sps:$4 sm:$0xff]   ;;  %v1979_v44 = vld [vmem:[#allocation3 + $0x8] sm:$0xff]  }
  0x35   :  { %358 = vmatprep.mubr.bf16.mxu0 %v2899_v0  ;;  %431 = vmatprep.mubr.bf16.mxu1 %v2899_v0  ;;  %v1920_v2 = vld [vmem:[#allocation6 + $0xec] ss:$16 sps:$4 sm:$0xff]   ;;  %v1922_v3 = vld [vmem:[#allocation6 + $0xe0] ss:$16 sps:$4 sm:$0xff]   ;;  %v1923_v4 = vld [vmem:[#allocation6 + $0xe8] ss:$16 sps:$4 sm:$0xff]  }
  0x36   :  { %326 = vmatprep.subr.bf16.mxu0 %v1918_v1  ;;  %399 = vmatprep.subr.bf16.mxu1 %v1920_v2  ;;  %v1924_v5 = vld [vmem:[#allocation6 + $0xc4] ss:$16 sps:$4 sm:$0xff]   ;;  %v1926_v6 = vld [vmem:[#allocation6 + $0xcc] ss:$16 sps:$4 sm:$0xff]   ;;  %v1928_v7 = vld [vmem:[#allocation6 + $0xc0] ss:$16 sps:$4 sm:$0xff]  }
  0x37   :  { %327 = vmatpush1.bf16.msra.mxu0 %v1922_v3  ;;  %400 = vmatpush1.bf16.msra.mxu1 %v1923_v4  ;;  %v1929_v8 = vld [vmem:[#allocation6 + $0xc8] ss:$16 sps:$4 sm:$0xff]   ;;  %v1930_v9 = vld [vmem:[#allocation6 + $0xa4] ss:$16 sps:$4 sm:$0xff]   ;;  %v1932_v10 = vld [vmem:[#allocation6 + $0xac] ss:$16 sps:$4 sm:$0xff]  }
  0x38   :  { %328 = vmatprep.subr.bf16.mxu0 %v1924_v5  ;;  %401 = vmatprep.subr.bf16.mxu1 %v1926_v6  ;;  %v1934_v11 = vld [vmem:[#allocation6 + $0xa0] ss:$16 sps:$4 sm:$0xff]   ;;  %v1935_v12 = vld [vmem:[#allocation6 + $0xa8] ss:$16 sps:$4 sm:$0xff]   ;;  %v1936_v13 = vld [vmem:[#allocation6 + $0x84] ss:$16 sps:$4 sm:$0xff]   ;;  %v122_v6 = vlaneseq }
  0x39   :  { %v1938_v14 = vld [vmem:[#allocation6 + $0x8c] ss:$16 sps:$4 sm:$0xff]   ;;  %v1940_v15 = vld [vmem:[#allocation6 + $0x80] ss:$16 sps:$4 sm:$0xff]   ;;  %v1941_v16 = vld [vmem:[#allocation6 + $0x88] ss:$16 sps:$4 sm:$0xff]  }
  0x3a   :  { %v1942_v17 = vld [vmem:[#allocation6 + $0x64] ss:$16 sps:$4 sm:$0xff]   ;;  %v1944_v18 = vld [vmem:[#allocation6 + $0x6c] ss:$16 sps:$4 sm:$0xff]   ;;  %v1946_v19 = vld [vmem:[#allocation6 + $0x60] ss:$16 sps:$4 sm:$0xff]  }
  0x3b   :  { %329 = vmatpush1.bf16.msra.mxu0 %v1928_v7  ;;  %402 = vmatpush1.bf16.msra.mxu1 %v1929_v8  ;;  %v1947_v20 = vld [vmem:[#allocation6 + $0x68] ss:$16 sps:$4 sm:$0xff]   ;;  %v1948_v21 = vld [vmem:[#allocation6 + $0x44] ss:$16 sps:$4 sm:$0xff]   ;;  %v1950_v22 = vld [vmem:[#allocation6 + $0x4c] ss:$16 sps:$4 sm:$0xff]  }
  0x3c   :  { %330 = vmatprep.subr.bf16.mxu0 %v1930_v9  ;;  %403 = vmatprep.subr.bf16.mxu1 %v1932_v10  ;;  %v1952_v23 = vld [vmem:[#allocation6 + $0x40] ss:$16 sps:$4 sm:$0xff]   ;;  %v1953_v24 = vld [vmem:[#allocation6 + $0x48] ss:$16 sps:$4 sm:$0xff]   ;;  %v1954_v25 = vld [vmem:[#allocation6 + $0x24] ss:$16 sps:$4 sm:$0xff]  }
  0x3d   :  { %v1956_v26 = vld [vmem:[#allocation6 + $0x2c] ss:$16 sps:$4 sm:$0xff]   ;;  %v1958_v27 = vld [vmem:[#allocation6 + $0x20] ss:$16 sps:$4 sm:$0xff]   ;;  %v1959_v28 = vld [vmem:[#allocation6 + $0x28] ss:$16 sps:$4 sm:$0xff]  }
  0x3e   :  { %v1960_v29 = vld [vmem:[#allocation6 + $0x4] ss:$16 sps:$4 sm:$0xff]   ;;  %v1962_v30 = vld [vmem:[#allocation6 + $0xc] ss:$16 sps:$4 sm:$0xff]   ;;  %v1964_v31 = vld [vmem:[#allocation6] ss:$16 sps:$4 sm:$0xff]  }
  0x3f   :  { %331 = vmatpush1.bf16.msra.mxu0 %v1934_v11  ;;  %404 = vmatpush1.bf16.msra.mxu1 %v1935_v12  ;;  %v1965_v32 = vld [vmem:[#allocation6 + $0x8] ss:$16 sps:$4 sm:$0xff]   ;;  %v2361_v33 = vld [vmem:[#allocation8 + $0xe4] ss:$16 sps:$4 sm:$0xff]   ;;  %v2363_v34 = vld [vmem:[#allocation8 + $0xec] ss:$16 sps:$4 sm:$0xff]  }
  0x40   :  { %332 = vmatprep.subr.bf16.mxu0 %v1936_v13  ;;  %405 = vmatprep.subr.bf16.mxu1 %v1938_v14  ;;  %v1966_v35 = vld [vmem:[#allocation3] sm:$0xff]   ;;  %v2367_v37 = vld [vmem:[#allocation8 + $0xe8] ss:$16 sps:$4 sm:$0xff]   ;;  %v2373_v39 = vld [vmem:[#allocation8 + $0xcc] ss:$16 sps:$4 sm:$0xff]   ;;  %v123_v7 = vshrl.u32 %v122_v6, 7 }
  0x41   :  { %v2365_v36 = vld [vmem:[#allocation8 + $0xe0] ss:$16 sps:$4 sm:$0xff]   ;;  %v2371_v38 = vld [vmem:[#allocation8 + $0xc4] ss:$16 sps:$4 sm:$0xff]   ;;  %v2379_v41 = vld [vmem:[#allocation8 + $0xc8] ss:$16 sps:$4 sm:$0xff]  }
  0x42   :  { %v2375_v40 = vld [vmem:[#allocation8 + $0xc0] ss:$16 sps:$4 sm:$0xff]   ;;  %v2383_v42 = vld [vmem:[#allocation8 + $0xa4] ss:$16 sps:$4 sm:$0xff]   ;;  %v2385_v43 = vld [vmem:[#allocation8 + $0xac] ss:$16 sps:$4 sm:$0xff]  }
  0x43   :  { %333 = vmatpush1.bf16.msra.mxu0 %v1940_v15  ;;  %406 = vmatpush1.bf16.msra.mxu1 %v1941_v16  ;;  %v2389_v45 = vld [vmem:[#allocation8 + $0xa0] ss:$16 sps:$4 sm:$0xff]   ;;  %v2391_v46 = vld [vmem:[#allocation8 + $0xa8] ss:$16 sps:$4 sm:$0xff]   ;;  %v2395_v47 = vld [vmem:[#allocation8 + $0x84] ss:$16 sps:$4 sm:$0xff]  }
  0x44   :  { %334 = vmatprep.subr.bf16.mxu0 %v1942_v17  ;;  %407 = vmatprep.subr.bf16.mxu1 %v1944_v18  ;;  %v2399_v48 = vld [vmem:[#allocation8 + $0x8c] ss:$16 sps:$4 sm:$0xff]   ;;  %v2401_v49 = vld [vmem:[#allocation8 + $0x80] ss:$16 sps:$4 sm:$0xff]   ;;  %v2403_v50 = vld [vmem:[#allocation8 + $0x88] ss:$16 sps:$4 sm:$0xff]  }
  0x45   :  { %v2407_v51 = vld [vmem:[#allocation8 + $0x64] ss:$16 sps:$4 sm:$0xff]   ;;  %v2411_v52 = vld [vmem:[#allocation8 + $0x6c] ss:$16 sps:$4 sm:$0xff]   ;;  %v2415_v54 = vld [vmem:[#allocation8 + $0x60] ss:$16 sps:$4 sm:$0xff]  }
  0x46   :  { %v1992_v53 = vld [vmem:[#allocation3 + $0x10] sm:$0xff]   ;;  %v2417_v55 = vld [vmem:[#allocation8 + $0x68] ss:$16 sps:$4 sm:$0xff]   ;;  %v2421_v57 = vld [vmem:[#allocation8 + $0x4c] ss:$16 sps:$4 sm:$0xff]   ;;  %v132_v8 = vsub.s32 2, %v123_v7 }
  0x47   :  { %335 = vmatpush1.bf16.msra.mxu0 %v1946_v19  ;;  %408 = vmatpush1.bf16.msra.mxu1 %v1947_v20  ;;  %v2419_v56 = vld [vmem:[#allocation8 + $0x44] ss:$16 sps:$4 sm:$0xff]   ;;  %v2429_v58 = vld [vmem:[#allocation8 + $0x40] ss:$16 sps:$4 sm:$0xff]   ;;  %v2431_v59 = vld [vmem:[#allocation8 + $0x48] ss:$16 sps:$4 sm:$0xff]  }
  0x48   :  { %336 = vmatprep.subr.bf16.mxu0 %v1948_v21  ;;  %409 = vmatprep.subr.bf16.mxu1 %v1950_v22  ;;  %v2435_v60 = vld [vmem:[#allocation8 + $0x24] ss:$16 sps:$4 sm:$0xff]   ;;  %v2437_v61 = vld [vmem:[#allocation8 + $0x2c] ss:$16 sps:$4 sm:$0xff]   ;;  %v2443_v63 = vld [vmem:[#allocation8 + $0x20] ss:$16 sps:$4 sm:$0xff]  }
  0x49   :  { %v2005_v62 = vld [vmem:[#allocation3 + $0x18] sm:$0xff]   ;;  %v2449_v2 = vld [vmem:[#allocation8 + $0x4] ss:$16 sps:$4 sm:$0xff]   ;;  %v2455_v4 = vld [vmem:[#allocation8] ss:$16 sps:$4 sm:$0xff]   ;;  %v124_v9 = vsub.s32 0, %v123_v7 }
  0x4a   :  { %v2445_v1 = vld [vmem:[#allocation8 + $0x28] ss:$16 sps:$4 sm:$0xff]   ;;  %v2451_v3 = vld [vmem:[#allocation8 + $0xc] ss:$16 sps:$4 sm:$0xff]   ;;  %v136_v10 = vsub.s32 3, %v123_v7  ;;  %v128_v15 = vsub.s32 1, %v123_v7 }
  0x4b   :  { %337 = vmatpush1.bf16.msra.mxu0 %v1952_v23  ;;  %410 = vmatpush1.bf16.msra.mxu1 %v1953_v24  ;;  %v2457_v5 = vld [vmem:[#allocation8 + $0x8] ss:$16 sps:$4 sm:$0xff]   ;;  %v120_v11 = vld [vmem:[%s2895_s3] sm:$0xf]  ;;  %vm2304_vm0 = vmmov 0   ;;  %s2305_s20 = smov [#allocation11]  }
  0x4c   :  { %338 = vmatprep.subr.bf16.mxu0 %v1954_v25  ;;  %411 = vmatprep.subr.bf16.mxu1 %v1956_v26  ;;  %v2510_v14 = vrot.slane %v120_v11, %v132_v8  ;;  %v125_v18 = vrot.slane %v120_v11, %v124_v9  ;;  %v2516_v19 = vrot.slane %v120_v11, %v136_v10  ;;  %s1758_s21 = sshll.u32 %s2305_s20, 4  ;;  %s1759_s21 = int_to_ptr.vmem [resolvable:$true] %s1758_s21 }
  0x4d   :  { %v129_v22 = vrot.slane %v120_v11, %v128_v15  ;;  %s2266_s22 = scalar_lea.vmem %s1759_s21, 128  ;;  %p2271_p7 = scmp.lt.s32.totalorder %s1759_s21, %s1759_s21 }
  0x4e   :  { %p2267_p6 = scmp.ne.s32.totalorder %s1759_s21, %s2266_s22  ;;  %p2272_p8 = scmp.lt.s32.totalorder %s2266_s22, %s2266_s22 }
  0x4f   :  { %339 = vmatpush1.bf16.msra.mxu0 %v1958_v27  ;;  %412 = vmatpush1.bf16.msra.mxu1 %v1959_v28 }
  0x50   :  { %340 = vmatprep.subr.bf16.mxu0 %v1960_v29  ;;  %413 = vmatprep.subr.bf16.mxu1 %v1962_v30  ;;  %p2273_p9 = por %p2272_p8, %p2271_p7 }
  0x52   :  { %p2274_p10 = pnand %p2273_p9, %p2267_p6 }
  0x53   :  { %341 = vmatpush1.bf16.msra.mxu0 %v1964_v31  ;;  %414 = vmatpush1.bf16.msra.mxu1 %v1965_v32 }
  0x54   :  { %703 = vmatprep.subr.bf16.mxu0 %v2361_v33  ;;  %744 = vmatprep.subr.bf16.mxu1 %v2363_v34 }
  0x56   :  { %359 = vmatmul.mubr.bf16.vlgmr.msra.gmra.mxu0 %v1966_v35  ;;  %432 = vmatmul.mubr.bf16.vlgmr.msra.gmra.mxu1 %v1966_v35 }
  0x57   :  { %704 = vmatpush1.bf16.msra.mxu0 %v2365_v36  ;;  %745 = vmatpush1.bf16.msra.mxu1 %v2367_v37 }
  0x58   :  { %705 = vmatprep.subr.bf16.mxu0 %v2371_v38  ;;  %746 = vmatprep.subr.bf16.mxu1 %v2373_v39 }
  0x59   :  { %368 = vmatprep.mubr.bf16.mxu0 %v2899_v0  ;;  %441 = vmatprep.mubr.bf16.mxu1 %v2899_v0 }
  0x5b   :  { %706 = vmatpush1.bf16.msra.mxu0 %v2375_v40  ;;  %747 = vmatpush1.bf16.msra.mxu1 %v2379_v41 }
  0x5c   :  { %707 = vmatprep.subr.bf16.mxu0 %v2383_v42  ;;  %748 = vmatprep.subr.bf16.mxu1 %v2385_v43 }
  0x5e   :  { %369 = vmatmul.mubr.bf16.gmra.mxu0 %v1979_v44  ;;  %442 = vmatmul.mubr.bf16.gmra.mxu1 %v1979_v44 }
  0x5f   :  { %708 = vmatpush1.bf16.msra.mxu0 %v2389_v45  ;;  %749 = vmatpush1.bf16.msra.mxu1 %v2391_v46 }
  0x60   :  { %709 = vmatprep.subr.bf16.mxu0 %v2395_v47  ;;  %750 = vmatprep.subr.bf16.mxu1 %v2399_v48 }
  0x61   :  { %378 = vmatprep.mubr.bf16.mxu0 %v2899_v0  ;;  %451 = vmatprep.mubr.bf16.mxu1 %v2899_v0 }
  0x63   :  { %710 = vmatpush1.bf16.msra.mxu0 %v2401_v49  ;;  %751 = vmatpush1.bf16.msra.mxu1 %v2403_v50 }
  0x64   :  { %711 = vmatprep.subr.bf16.mxu0 %v2407_v51  ;;  %752 = vmatprep.subr.bf16.mxu1 %v2411_v52 }
  0x66   :  { %379 = vmatmul.mubr.bf16.gmra.mxu0 %v1992_v53  ;;  %452 = vmatmul.mubr.bf16.gmra.mxu1 %v1992_v53 }
  0x67   :  { %712 = vmatpush1.bf16.msra.mxu0 %v2415_v54  ;;  %753 = vmatpush1.bf16.msra.mxu1 %v2417_v55 }
  0x68   :  { %713 = vmatprep.subr.bf16.mxu0 %v2419_v56  ;;  %754 = vmatprep.subr.bf16.mxu1 %v2421_v57 }
  0x69   :  { %388 = vmatprep.mubr.bf16.mxu0 %v2899_v0  ;;  %461 = vmatprep.mubr.bf16.mxu1 %v2899_v0 }
  0x6b   :  { %714 = vmatpush1.bf16.msra.mxu0 %v2429_v58  ;;  %755 = vmatpush1.bf16.msra.mxu1 %v2431_v59 }
  0x6c   :  { %715 = vmatprep.subr.bf16.mxu0 %v2435_v60  ;;  %756 = vmatprep.subr.bf16.mxu1 %v2437_v61 }
  0x6e   :  { %389 = vmatmul.mubr.bf16.gmra.mxu0 %v2005_v62  ;;  %462 = vmatmul.mubr.bf16.gmra.mxu1 %v2005_v62 }
  0x6f   :  { %716 = vmatpush1.bf16.msra.mxu0 %v2443_v63  ;;  %757 = vmatpush1.bf16.msra.mxu1 %v2445_v1 }
  0x70   :  { %717 = vmatprep.subr.bf16.mxu0 %v2449_v2  ;;  %758 = vmatprep.subr.bf16.mxu1 %v2451_v3 }
  0x71   :  { %735 = vmatprep.mubr.bf16.mxu0 %v2899_v0  ;;  %776 = vmatprep.mubr.bf16.mxu1 %v2899_v0 }
  0x73   :  { %718 = vmatpush1.bf16.msra.mxu0 %v2455_v4  ;;  %759 = vmatpush1.bf16.msra.mxu1 %v2457_v5 }
  0x74   :  { %821 = vmatprep.subr.bf16.mxu0 %v2361_v33  ;;  %862 = vmatprep.subr.bf16.mxu1 %v2363_v34 }
  0x76   :  { %736 = vmatmul.mubr.bf16.vlgmr.msra.gmra.mxu0 %v2899_v0  ;;  %777 = vmatmul.mubr.bf16.vlgmr.msra.gmra.mxu1 %v2899_v0 }
  0x77   :  { %822 = vmatpush1.bf16.msra.mxu0 %v2365_v36  ;;  %863 = vmatpush1.bf16.msra.mxu1 %v2367_v37 }
  0x78   :  { %823 = vmatprep.subr.bf16.mxu0 %v2371_v38  ;;  %864 = vmatprep.subr.bf16.mxu1 %v2373_v39 }
  0x79   :  { %853 = vmatprep.mubr.bf16.mxu0 %v2899_v0  ;;  %894 = vmatprep.mubr.bf16.mxu1 %v2899_v0 }
  0x7b   :  { %824 = vmatpush1.bf16.msra.mxu0 %v2375_v40  ;;  %865 = vmatpush1.bf16.msra.mxu1 %v2379_v41 }
  0x7c   :  { %825 = vmatprep.subr.bf16.mxu0 %v2383_v42  ;;  %866 = vmatprep.subr.bf16.mxu1 %v2385_v43 }
  0x7f   :  { %826 = vmatpush1.bf16.msra.mxu0 %v2389_v45  ;;  %867 = vmatpush1.bf16.msra.mxu1 %v2391_v46 }
  0x80   :  { %827 = vmatprep.subr.bf16.mxu0 %v2395_v47  ;;  %868 = vmatprep.subr.bf16.mxu1 %v2399_v48 }
  0x83   :  { %828 = vmatpush1.bf16.msra.mxu0 %v2401_v49  ;;  %869 = vmatpush1.bf16.msra.mxu1 %v2403_v50 }
  0x84   :  { %829 = vmatprep.subr.bf16.mxu0 %v2407_v51  ;;  %870 = vmatprep.subr.bf16.mxu1 %v2411_v52 }
  0x87   :  { %830 = vmatpush1.bf16.msra.mxu0 %v2415_v54  ;;  %871 = vmatpush1.bf16.msra.mxu1 %v2417_v55 }
  0x88   :  { %831 = vmatprep.subr.bf16.mxu0 %v2419_v56  ;;  %872 = vmatprep.subr.bf16.mxu1 %v2421_v57 }
  0x8b   :  { %832 = vmatpush1.bf16.msra.mxu0 %v2429_v58  ;;  %873 = vmatpush1.bf16.msra.mxu1 %v2431_v59 }
  0x8c   :  { %833 = vmatprep.subr.bf16.mxu0 %v2435_v60  ;;  %874 = vmatprep.subr.bf16.mxu1 %v2437_v61 }
  0x8f   :  { %834 = vmatpush1.bf16.msra.mxu0 %v2443_v63  ;;  %875 = vmatpush1.bf16.msra.mxu1 %v2445_v1 }
  0x90   :  { %835 = vmatprep.subr.bf16.mxu0 %v2449_v2  ;;  %876 = vmatprep.subr.bf16.mxu1 %v2451_v3 }
  0x93   :  { %836 = vmatpush1.bf16.msra.mxu0 %v2455_v4  ;;  %877 = vmatpush1.bf16.msra.mxu1 %v2457_v5 }
  0x94   :  { %939 = vmatprep.subr.bf16.mxu0 %v2361_v33  ;;  %980 = vmatprep.subr.bf16.mxu1 %v2363_v34 }
 0x116   :  { %v2506_v12 = vpop.f32.mrf.mxu0  ;;  %v2508_v13 = vpop.f32.mrf.mxu1 }
 0x118   :  { %v2512_v16 = vpop.f32.mrf.mxu0  ;;  %v2514_v17 = vpop.f32.mrf.mxu1 }
 0x11a   :  { %v364_v20 = vpop.f32.mrf.mxu0  ;;  %v437_v21 = vpop.f32.mrf.mxu1 }
 0x11b   :  { %v2518_v23 = vadd.f32 %v364_v20, %v125_v18  ;;  %v2521_v24 = vadd.f32 %v437_v21, %v2510_v14 }
 0x11c   :  { %v366_v25 = vpop.f32.mrf.mxu0  ;;  %v439_v26 = vpop.f32.mrf.mxu1 }
 0x11d   :  { %v2523_v27 = vadd.f32 %v366_v25, %v129_v22  ;;  %v2526_v28 = vadd.f32 %v439_v26, %v2516_v19 }
 0x11e   :  { %v370_v29 = vpop.f32.mrf.mxu0  ;;  %v443_v30 = vpop.f32.mrf.mxu1 }
 0x11f   :  { %v2528_v31 = vadd.f32 %v370_v29, %v125_v18  ;;  %v2531_v32 = vadd.f32 %v443_v30, %v2510_v14 }
 0x120   :  { %v372_v35 = vpop.f32.mrf.mxu0  ;;  %v445_v44 = vpop.f32.mrf.mxu1 }
 0x121   :  { %2901 = vst [vmem:[#allocation16_spill] sm:$0xff] %v2531_v32  ;;  %v2533_v53 = vadd.f32 %v372_v35, %v129_v22  ;;  %v2536_v62 = vadd.f32 %v445_v44, %v2516_v19 }
 0x122   :  { %v374_v6 = vpop.f32.mrf.mxu0  ;;  %v447_v7 = vpop.f32.mrf.mxu1 }
 0x123   :  { %v2538_v8 = vadd.f32 %v374_v6, %v125_v18  ;;  %v2541_v9 = vadd.f32 %v447_v7, %v2510_v14 }
 0x124   :  { %v376_v10 = vpop.f32.mrf.mxu0  ;;  %v449_v11 = vpop.f32.mrf.mxu1 }
 0x125   :  { %2902 = vst [vmem:[#allocation17_spill] sm:$0xff] %v2538_v8  ;;  %2903 = vst [vmem:[#allocation18_spill] sm:$0xff] %v2541_v9  ;;  %v2543_v15 = vadd.f32 %v376_v10, %v129_v22  ;;  %v2546_v20 = vadd.f32 %v449_v11, %v2516_v19 }
 0x126   :  { %v380_v21 = vpop.f32.mrf.mxu0  ;;  %v453_v25 = vpop.f32.mrf.mxu1 }
 0x127   :  { %2904 = vst [vmem:[#allocation19_spill] sm:$0xff] %v2543_v15  ;;  %2905 = vst [vmem:[#allocation20_spill] sm:$0xff] %v2546_v20  ;;  %v2548_v26 = vadd.f32 %v380_v21, %v125_v18  ;;  %v2551_v29 = vadd.f32 %v453_v25, %v2510_v14 }
 0x128   :  { %v382_v30 = vpop.f32.mrf.mxu0  ;;  %v455_v35 = vpop.f32.mrf.mxu1 }
 0x129   :  { %2906 = vst [vmem:[#allocation21_spill] sm:$0xff] %v2548_v26  ;;  %2907 = vst [vmem:[#allocation22_spill] sm:$0xff] %v2551_v29  ;;  %v2553_v44 = vadd.f32 %v382_v30, %v129_v22  ;;  %v2556_v6 = vadd.f32 %v455_v35, %v2516_v19 }
 0x12a   :  { %v384_v7 = vpop.f32.mrf.mxu0  ;;  %v457_v10 = vpop.f32.mrf.mxu1 }
 0x12b   :  { %2908 = vst [vmem:[#allocation23_spill] sm:$0xff] %v2553_v44  ;;  %2909 = vst [vmem:[#allocation24_spill] sm:$0xff] %v2556_v6  ;;  %v2558_v0 = vadd.f32 %v384_v7, %v125_v18  ;;  %v2561_v11 = vadd.f32 %v457_v10, %v2510_v14 }
 0x12c   :  { %v386_v9 = vpop.f32.mrf.mxu0  ;;  %v459_v21 = vpop.f32.mrf.mxu1 }
 0x12d   :  { %2910 = vst [vmem:[#allocation25_spill] sm:$0xff] %v2558_v0  ;;  %2911 = vst [vmem:[#allocation26_spill] sm:$0xff] %v2561_v11  ;;  %v2563_v26 = vadd.f32 %v386_v9, %v129_v22  ;;  %v2566_v25 = vadd.f32 %v459_v21, %v2516_v19 }
 0x12e   :  { %v390_v29 = vpop.f32.mrf.mxu0  ;;  %v463_v30 = vpop.f32.mrf.mxu1 }
 0x12f   :  { %2912 = vst [vmem:[#allocation27_spill] sm:$0xff] %v2563_v26  ;;  %2913 = vst [vmem:[#allocation28_spill] sm:$0xff] %v2566_v25  ;;  %v2568_v44 = vadd.f32 %v390_v29, %v125_v18  ;;  %v2571_v35 = vadd.f32 %v463_v30, %v2510_v14 }
 0x130   :  { %v392_v6 = vpop.f32.mrf.mxu0  ;;  %v465_v7 = vpop.f32.mrf.mxu1 }
 0x131   :  { %2914 = vst [vmem:[#allocation29_spill] sm:$0xff] %v2568_v44  ;;  %2915 = vst [vmem:[#allocation30_spill] sm:$0xff] %v2571_v35  ;;  %v2573_v0 = vadd.f32 %v392_v6, %v129_v22  ;;  %v2576_v10 = vadd.f32 %v465_v7, %v2516_v19  ;;  %v361_v44 = vadd.f32 %v2506_v12, %v125_v18 }
 0x132   :  { %v394_v11 = vpop.f32.mrf.mxu0  ;;  %v467_v9 = vpop.f32.mrf.mxu1  ;;  %v363_v7 = vadd.f32 %v2512_v16, %v129_v22 }
 0x133   :  { %2916 = vst [vmem:[#allocation31_spill] sm:$0xff] %v2573_v0  ;;  %2917 = vst [vmem:[#allocation32_spill] sm:$0xff] %v2576_v10  ;;  %v2578_v26 = vadd.f32 %v394_v11, %v125_v18  ;;  %v2581_v21 = vadd.f32 %v467_v9, %v2510_v14  ;;  %v436_v18 = vadd.f32 %v2514_v17, %v2516_v19 }
 0x134   :  { %v396_v25 = vpop.f32.mrf.mxu0  ;;  %v469_v29 = vpop.f32.mrf.mxu1 }
 0x135   :  { %2918 = vst [vmem:[#allocation33_spill] sm:$0xff] %v2578_v26  ;;  %2919 = vst [vmem:[#allocation34_spill] sm:$0xff] %v2581_v21  ;;  %v2584_v30 = vadd.f32 %v396_v25, %v129_v22  ;;  %v2587_v35 = vadd.f32 %v469_v29, %v2516_v19  ;;  %v434_v29 = vadd.f32 %v2508_v13, %v2510_v14 }
 0x136   :  { %v737_v6 = vpop.f32.mrf.mxu0  ;;  %v778_v0 = vpop.f32.mrf.mxu1 }
 0x137   :  { %v785_v10 = vadd.f32 %v737_v6, %v361_v44  ;;  %v787_v44 = vadd.f32 %v778_v0, %v434_v29 }
 0x138   :  { %v739_v20 = vpop.f32.mrf.mxu0  ;;  %v780_v11 = vpop.f32.mrf.mxu1 }
 0x139   :  { %v1844_v26 = vmul.f32 -1.442695, %v785_v10  ;;  %v786_v15 = vadd.f32 %v739_v20, %v363_v7  ;;  %v788_v25 = vadd.f32 %v780_v11, %v436_v18 }
 0x13a   :  { %v741_v9 = vpop.f32.mrf.mxu0  ;;  %v782_v21 = vpop.f32.mrf.mxu1 }
 0x13b   :  { %2026 = vpow2.f32 %v1844_v26  ;;  %v1845_v8 = vmul.f32 -1.442695, %v786_v15  ;;  %v1846_v16 = vmul.f32 -1.442695, %v788_v25  ;;  %v2920_v9 = vmov 0  }
 0x13c   :  { %v742_v32 = vpop.f32.mrf.mxu0  ;;  %v783_v12 = vpop.f32.mrf.mxu1 }
 0x13d   :  { %2028 = vpow2.f32 %v1845_v8 }
 0x13e   :  { %2030 = vpow2.f32 %v1846_v16 }
 0x148   :  { %v2027_v22 = vpop.eup %2026 }
 0x149   :  { %v792_v6 = vadd.f32 1.0, %v2027_v22 }
 0x14a   :  { %v2029_v10 = vpop.eup %2028 }
 0x14b   :  { %2032 = vrcp.f32 %v792_v6  ;;  %v798_v20 = vadd.f32 1.0, %v2029_v10  ;;  %v2031_v32 = vpop.eup %2030 }
 0x14c   :  { %2034 = vtanh.f32 %v787_v44  ;;  %v805_v21 = vadd.f32 1.0, %v2031_v32 }
 0x14d   :  { %2036 = vrcp.f32 %v798_v20 }
 0x14e   :  { %2038 = vrcp.f32 %v805_v21 }
 0x158   :  { %v2033_v15 = vpop.eup %2032 }
 0x159   :  { %v2035_v8 = vpop.eup %2034 }
 0x15a   :  { %v2037_v26 = vpop.eup %2036  ;;  %v809_v19 = vmul.f32 %v2035_v8, %v2033_v15 }
 0x15b   :  { %v808_v17 = vmul.f32 0.0, %v2037_v26  ;;  %v2039_v0 = vpop.eup %2038 }
 0x15d   :  { %v2594_v7 = vadd.f32 %v809_v19, %v808_v17 }
 0x15f   :  { %2040 = vtanh.f32 %v2594_v7 }
 0x16c   :  { %v2041_v13 = vpop.eup %2040 }
 0x16d   :  { %v812_v14 = vmul.f32 %v2041_v13, %v2039_v0 }
 0x16f   :  { %v820_v11 = vpack.c.bf16 %v812_v14, %v812_v14 }
 0x171   :  { %854 = vmatmul.mubr.bf16.vlgmr.msra.gmra.mxu0 %v820_v11  ;;  %895 = vmatmul.mubr.bf16.vlgmr.msra.gmra.mxu1 %v820_v11 }
 0x172   :  { %940 = vmatpush1.bf16.msra.mxu0 %v2365_v36  ;;  %981 = vmatpush1.bf16.msra.mxu1 %v2367_v37 }
 0x173   :  { %941 = vmatprep.subr.bf16.mxu0 %v2371_v38  ;;  %982 = vmatprep.subr.bf16.mxu1 %v2373_v39 }
 0x174   :  { %971 = vmatprep.mubr.bf16.mxu0 %v2920_v9  ;;  %1012 = vmatprep.mubr.bf16.mxu1 %v2920_v9 }
 0x176   :  { %942 = vmatpush1.bf16.msra.mxu0 %v2375_v40  ;;  %983 = vmatpush1.bf16.msra.mxu1 %v2379_v41 }
 0x177   :  { %943 = vmatprep.subr.bf16.mxu0 %v2383_v42  ;;  %984 = vmatprep.subr.bf16.mxu1 %v2385_v43 }
 0x17a   :  { %944 = vmatpush1.bf16.msra.mxu0 %v2389_v45  ;;  %985 = vmatpush1.bf16.msra.mxu1 %v2391_v46 }
 0x17b   :  { %945 = vmatprep.subr.bf16.mxu0 %v2395_v47  ;;  %986 = vmatprep.subr.bf16.mxu1 %v2399_v48 }
 0x17e   :  { %946 = vmatpush1.bf16.msra.mxu0 %v2401_v49  ;;  %987 = vmatpush1.bf16.msra.mxu1 %v2403_v50 }
 0x17f   :  { %947 = vmatprep.subr.bf16.mxu0 %v2407_v51  ;;  %988 = vmatprep.subr.bf16.mxu1 %v2411_v52 }
 0x182   :  { %948 = vmatpush1.bf16.msra.mxu0 %v2415_v54  ;;  %989 = vmatpush1.bf16.msra.mxu1 %v2417_v55 }
 0x183   :  { %949 = vmatprep.subr.bf16.mxu0 %v2419_v56  ;;  %990 = vmatprep.subr.bf16.mxu1 %v2421_v57 }
 0x186   :  { %950 = vmatpush1.bf16.msra.mxu0 %v2429_v58  ;;  %991 = vmatpush1.bf16.msra.mxu1 %v2431_v59 }
 0x187   :  { %951 = vmatprep.subr.bf16.mxu0 %v2435_v60  ;;  %992 = vmatprep.subr.bf16.mxu1 %v2437_v61 }
 0x18a   :  { %952 = vmatpush1.bf16.msra.mxu0 %v2443_v63  ;;  %993 = vmatpush1.bf16.msra.mxu1 %v2445_v1 }
 0x18b   :  { %953 = vmatprep.subr.bf16.mxu0 %v2449_v2  ;;  %994 = vmatprep.subr.bf16.mxu1 %v2451_v3 }
 0x18e   :  { %954 = vmatpush1.bf16.msra.mxu0 %v2455_v4  ;;  %995 = vmatpush1.bf16.msra.mxu1 %v2457_v5 }
 0x18f   :  { %1057 = vmatprep.subr.bf16.mxu0 %v2361_v33  ;;  %1098 = vmatprep.subr.bf16.mxu1 %v2363_v34 }
 0x231   :  { %v855_v12 = vpop.f32.mrf.mxu0  ;;  %v896_v18 = vpop.f32.mrf.mxu1 }
 0x232   :  { %v903_v25 = vadd.f32 %v855_v12, %v2518_v23  ;;  %v905_v26 = vadd.f32 %v896_v18, %v2521_v24 }
 0x233   :  { %v857_v29 = vpop.f32.mrf.mxu0  ;;  %v898_v16 = vpop.f32.mrf.mxu1 }
 0x234   :  { %v1847_v22 = vmul.f32 -1.442695, %v903_v25  ;;  %v904_v44 = vadd.f32 %v857_v29, %v2523_v27  ;;  %v906_v8 = vadd.f32 %v898_v16, %v2526_v28 }
 0x235   :  { %v859_v6 = vpop.f32.mrf.mxu0  ;;  %v900_v10 = vpop.f32.mrf.mxu1 }
 0x236   :  { %2042 = vpow2.f32 %v1847_v22  ;;  %v1848_v20 = vmul.f32 -1.442695, %v904_v44  ;;  %v1849_v21 = vmul.f32 -1.442695, %v906_v8 }
 0x237   :  { %v860_v32 = vpop.f32.mrf.mxu0  ;;  %v901_v15 = vpop.f32.mrf.mxu1 }
 0x238   :  { %2044 = vpow2.f32 %v1848_v20 }
 0x239   :  { %2046 = vtanh.f32 %v905_v26 }
 0x23a   :  { %2048 = vpow2.f32 %v1849_v21 }
 0x243   :  { %v2043_v17 = vpop.eup %2042 }
 0x244   :  { %v910_v19 = vadd.f32 1.0, %v2043_v17 }
 0x245   :  { %v2045_v23 = vpop.eup %2044 }
 0x246   :  { %2050 = vrcp.f32 %v910_v19  ;;  %v916_v0 = vadd.f32 1.0, %v2045_v23  ;;  %v2047_v27 = vpop.eup %2046 }
 0x247   :  { %v2049_v13 = vpop.eup %2048 }
 0x248   :  { %2052 = vrcp.f32 %v916_v0  ;;  %v923_v25 = vadd.f32 1.0, %v2049_v13  ;;  %v2921_v0 = vld [vmem:[#allocation16_spill] sm:$0xff] }
 0x24a   :  { %2054 = vrcp.f32 %v923_v25 }
 0x253   :  { %v2051_v14 = vpop.eup %2050 }
 0x254   :  { %v927_v11 = vmul.f32 %v2051_v14, %v2047_v27 }
 0x255   :  { %v2053_v12 = vpop.eup %2052 }
 0x256   :  { %v926_v29 = vmul.f32 %v2053_v12, %v2594_v7 }
 0x257   :  { %v2055_v24 = vpop.eup %2054 }
 0x258   :  { %v2636_v28 = vadd.f32 %v927_v11, %v926_v29 }
 0x25a   :  { %2056 = vtanh.f32 %v2636_v28 }
 0x267   :  { %v2057_v18 = vpop.eup %2056 }
 0x268   :  { %v930_v16 = vmul.f32 %v2057_v18, %v2055_v24 }
 0x26a   :  { %v938_v22 = vpack.c.bf16 %v930_v16, %v930_v16 }
 0x26c   :  { %972 = vmatmul.mubr.bf16.vlgmr.msra.gmra.mxu0 %v938_v22  ;;  %1013 = vmatmul.mubr.bf16.vlgmr.msra.gmra.mxu1 %v938_v22 }
 0x26d   :  { %1058 = vmatpush1.bf16.msra.mxu0 %v2365_v36  ;;  %1099 = vmatpush1.bf16.msra.mxu1 %v2367_v37 }
 0x26e   :  { %1059 = vmatprep.subr.bf16.mxu0 %v2371_v38  ;;  %1100 = vmatprep.subr.bf16.mxu1 %v2373_v39 }
 0x26f   :  { %1089 = vmatprep.mubr.bf16.mxu0 %v2920_v9  ;;  %1130 = vmatprep.mubr.bf16.mxu1 %v2920_v9 }
 0x271   :  { %1060 = vmatpush1.bf16.msra.mxu0 %v2375_v40  ;;  %1101 = vmatpush1.bf16.msra.mxu1 %v2379_v41 }
 0x272   :  { %1061 = vmatprep.subr.bf16.mxu0 %v2383_v42  ;;  %1102 = vmatprep.subr.bf16.mxu1 %v2385_v43 }
 0x275   :  { %1062 = vmatpush1.bf16.msra.mxu0 %v2389_v45  ;;  %1103 = vmatpush1.bf16.msra.mxu1 %v2391_v46 }
 0x276   :  { %1063 = vmatprep.subr.bf16.mxu0 %v2395_v47  ;;  %1104 = vmatprep.subr.bf16.mxu1 %v2399_v48 }
 0x279   :  { %1064 = vmatpush1.bf16.msra.mxu0 %v2401_v49  ;;  %1105 = vmatpush1.bf16.msra.mxu1 %v2403_v50 }
 0x27a   :  { %1065 = vmatprep.subr.bf16.mxu0 %v2407_v51  ;;  %1106 = vmatprep.subr.bf16.mxu1 %v2411_v52 }
 0x27d   :  { %1066 = vmatpush1.bf16.msra.mxu0 %v2415_v54  ;;  %1107 = vmatpush1.bf16.msra.mxu1 %v2417_v55 }
 0x27e   :  { %1067 = vmatprep.subr.bf16.mxu0 %v2419_v56  ;;  %1108 = vmatprep.subr.bf16.mxu1 %v2421_v57 }
 0x281   :  { %1068 = vmatpush1.bf16.msra.mxu0 %v2429_v58  ;;  %1109 = vmatpush1.bf16.msra.mxu1 %v2431_v59 }
 0x282   :  { %1069 = vmatprep.subr.bf16.mxu0 %v2435_v60  ;;  %1110 = vmatprep.subr.bf16.mxu1 %v2437_v61 }
 0x285   :  { %1070 = vmatpush1.bf16.msra.mxu0 %v2443_v63  ;;  %1111 = vmatpush1.bf16.msra.mxu1 %v2445_v1 }
 0x286   :  { %1071 = vmatprep.subr.bf16.mxu0 %v2449_v2  ;;  %1112 = vmatprep.subr.bf16.mxu1 %v2451_v3 }
 0x289   :  { %1072 = vmatpush1.bf16.msra.mxu0 %v2455_v4  ;;  %1113 = vmatpush1.bf16.msra.mxu1 %v2457_v5 }
 0x28a   :  { %1175 = vmatprep.subr.bf16.mxu0 %v2361_v33  ;;  %1216 = vmatprep.subr.bf16.mxu1 %v2363_v34 }
 0x32c   :  { %v973_v7 = vpop.f32.mrf.mxu0  ;;  %v1014_v44 = vpop.f32.mrf.mxu1 }
 0x32d   :  { %v1021_v6 = vadd.f32 %v973_v7, %v2528_v31  ;;  %v1023_v27 = vadd.f32 %v1014_v44, %v2921_v0 }
 0x32e   :  { %v975_v10 = vpop.f32.mrf.mxu0  ;;  %v1016_v20 = vpop.f32.mrf.mxu1 }
 0x32f   :  { %v1850_v32 = vmul.f32 -1.442695, %v1021_v6  ;;  %v1022_v15 = vadd.f32 %v975_v10, %v2533_v53  ;;  %v1024_v23 = vadd.f32 %v1016_v20, %v2536_v62 }
 0x330   :  { %v977_v8 = vpop.f32.mrf.mxu0  ;;  %v1018_v26 = vpop.f32.mrf.mxu1 }
 0x331   :  { %2058 = vpow2.f32 %v1850_v32  ;;  %v1851_v21 = vmul.f32 -1.442695, %v1022_v15  ;;  %v1852_v13 = vmul.f32 -1.442695, %v1024_v23  ;;  %v2922_v32 = vld [vmem:[#allocation17_spill] sm:$0xff] }
 0x332   :  { %v978_v17 = vpop.f32.mrf.mxu0  ;;  %v1019_v19 = vpop.f32.mrf.mxu1 }
 0x333   :  { %2060 = vpow2.f32 %v1851_v21  ;;  %v2923_v17 = vld [vmem:[#allocation19_spill] sm:$0xff] }
 0x334   :  { %2062 = vtanh.f32 %v1023_v27 }
 0x335   :  { %2064 = vpow2.f32 %v1852_v13 }
 0x33e   :  { %v2059_v14 = vpop.eup %2058 }
 0x33f   :  { %v1028_v11 = vadd.f32 1.0, %v2059_v14 }
 0x340   :  { %v2061_v31 = vpop.eup %2060 }
 0x341   :  { %2066 = vrcp.f32 %v1028_v11  ;;  %v1034_v12 = vadd.f32 1.0, %v2061_v31  ;;  %v2063_v53 = vpop.eup %2062  ;;  %v2924_v11 = vld [vmem:[#allocation20_spill] sm:$0xff]  ;;  %v2925_v31 = vld [vmem:[#allocation18_spill] sm:$0xff] }
 0x342   :  { %v2065_v25 = vpop.eup %2064 }
 0x343   :  { %2068 = vrcp.f32 %v1034_v12  ;;  %v1041_v16 = vadd.f32 1.0, %v2065_v25 }
 0x345   :  { %2070 = vrcp.f32 %v1041_v16 }
 0x34e   :  { %v2067_v29 = vpop.eup %2066 }
 0x34f   :  { %v1045_v24 = vmul.f32 %v2067_v29, %v2063_v53 }
 0x350   :  { %v2069_v18 = vpop.eup %2068 }
 0x351   :  { %v1044_v22 = vmul.f32 %v2069_v18, %v2636_v28 }
 0x352   :  { %v2071_v7 = vpop.eup %2070 }
 0x353   :  { %v2678_v62 = vadd.f32 %v1045_v24, %v1044_v22 }
 0x355   :  { %2072 = vtanh.f32 %v2678_v62 }
 0x362   :  { %v2073_v44 = vpop.eup %2072 }
 0x363   :  { %v1048_v6 = vmul.f32 %v2073_v44, %v2071_v7 }
 0x365   :  { %v1056_v10 = vpack.c.bf16 %v1048_v6, %v1048_v6 }
 0x367   :  { %1090 = vmatmul.mubr.bf16.vlgmr.msra.gmra.mxu0 %v1056_v10  ;;  %1131 = vmatmul.mubr.bf16.vlgmr.msra.gmra.mxu1 %v1056_v10 }
 0x368   :  { %1176 = vmatpush1.bf16.msra.mxu0 %v2365_v36  ;;  %1217 = vmatpush1.bf16.msra.mxu1 %v2367_v37 }
 0x369   :  { %1177 = vmatprep.subr.bf16.mxu0 %v2371_v38  ;;  %1218 = vmatprep.subr.bf16.mxu1 %v2373_v39 }
 0x36a   :  { %1207 = vmatprep.mubr.bf16.mxu0 %v2920_v9  ;;  %1248 = vmatprep.mubr.bf16.mxu1 %v2920_v9 }
 0x36c   :  { %1178 = vmatpush1.bf16.msra.mxu0 %v2375_v40  ;;  %1219 = vmatpush1.bf16.msra.mxu1 %v2379_v41 }
 0x36d   :  { %1179 = vmatprep.subr.bf16.mxu0 %v2383_v42  ;;  %1220 = vmatprep.subr.bf16.mxu1 %v2385_v43 }
 0x370   :  { %1180 = vmatpush1.bf16.msra.mxu0 %v2389_v45  ;;  %1221 = vmatpush1.bf16.msra.mxu1 %v2391_v46 }
 0x371   :  { %1181 = vmatprep.subr.bf16.mxu0 %v2395_v47  ;;  %1222 = vmatprep.subr.bf16.mxu1 %v2399_v48 }
 0x374   :  { %1182 = vmatpush1.bf16.msra.mxu0 %v2401_v49  ;;  %1223 = vmatpush1.bf16.msra.mxu1 %v2403_v50 }
 0x375   :  { %1183 = vmatprep.subr.bf16.mxu0 %v2407_v51  ;;  %1224 = vmatprep.subr.bf16.mxu1 %v2411_v52 }
 0x378   :  { %1184 = vmatpush1.bf16.msra.mxu0 %v2415_v54  ;;  %1225 = vmatpush1.bf16.msra.mxu1 %v2417_v55 }
 0x379   :  { %1185 = vmatprep.subr.bf16.mxu0 %v2419_v56  ;;  %1226 = vmatprep.subr.bf16.mxu1 %v2421_v57 }
 0x37c   :  { %1186 = vmatpush1.bf16.msra.mxu0 %v2429_v58  ;;  %1227 = vmatpush1.bf16.msra.mxu1 %v2431_v59 }
 0x37d   :  { %1187 = vmatprep.subr.bf16.mxu0 %v2435_v60  ;;  %1228 = vmatprep.subr.bf16.mxu1 %v2437_v61 }
 0x380   :  { %1188 = vmatpush1.bf16.msra.mxu0 %v2443_v63  ;;  %1229 = vmatpush1.bf16.msra.mxu1 %v2445_v1 }
 0x381   :  { %1189 = vmatprep.subr.bf16.mxu0 %v2449_v2  ;;  %1230 = vmatprep.subr.bf16.mxu1 %v2451_v3 }
 0x384   :  { %1190 = vmatpush1.bf16.msra.mxu0 %v2455_v4  ;;  %1231 = vmatpush1.bf16.msra.mxu1 %v2457_v5 }
 0x385   :  { %1293 = vmatprep.subr.bf16.mxu0 %v2361_v33  ;;  %1334 = vmatprep.subr.bf16.mxu1 %v2363_v34 }
 0x427   :  { %v1091_v28 = vpop.f32.mrf.mxu0  ;;  %v1132_v20 = vpop.f32.mrf.mxu1 }
 0x428   :  { %v1139_v15 = vadd.f32 %v1091_v28, %v2922_v32  ;;  %v1141_v34 = vadd.f32 %v1132_v20, %v2925_v31 }
 0x429   :  { %v1093_v8 = vpop.f32.mrf.mxu0  ;;  %v1134_v26 = vpop.f32.mrf.mxu1 }
 0x42a   :  { %v1853_v21 = vmul.f32 -1.442695, %v1139_v15  ;;  %v1140_v19 = vadd.f32 %v1093_v8, %v2923_v17  ;;  %v1142_v33 = vadd.f32 %v1134_v26, %v2924_v11 }
 0x42b   :  { %v1095_v23 = vpop.f32.mrf.mxu0  ;;  %v1136_v0 = vpop.f32.mrf.mxu1 }
 0x42c   :  { %2074 = vpow2.f32 %v1853_v21  ;;  %v1854_v27 = vmul.f32 -1.442695, %v1140_v19  ;;  %v1855_v12 = vmul.f32 -1.442695, %v1142_v33 }
 0x42d   :  { %v1096_v13 = vpop.f32.mrf.mxu0  ;;  %v1137_v14 = vpop.f32.mrf.mxu1 }
 0x42e   :  { %2076 = vpow2.f32 %v1854_v27 }
 0x42f   :  { %2078 = vtanh.f32 %v1141_v34 }
 0x430   :  { %2080 = vpow2.f32 %v1855_v12 }
 0x439   :  { %v2075_v53 = vpop.eup %2074 }
 0x43a   :  { %v1146_v25 = vadd.f32 1.0, %v2075_v53 }
 0x43b   :  { %v2077_v29 = vpop.eup %2076 }
 0x43c   :  { %2082 = vrcp.f32 %v1146_v25  ;;  %v1152_v24 = vadd.f32 1.0, %v2077_v29  ;;  %v2079_v18 = vpop.eup %2078  ;;  %v2769_v29 = vld [vmem:[#allocation8 + $0xe0] ss:$16 sps:$4 sm:$0xff]  }
 0x43d   :  { %v2081_v16 = vpop.eup %2080 }
 0x43e   :  { %2084 = vrcp.f32 %v1152_v24  ;;  %v1159_v6 = vadd.f32 1.0, %v2081_v16  ;;  %v2772_v24 = vld [vmem:[#allocation8 + $0xe8] ss:$16 sps:$4 sm:$0xff]   ;;  %v2778_v16 = vld [vmem:[#allocation8 + $0xcc] ss:$16 sps:$4 sm:$0xff]  }
 0x440   :  { %2086 = vrcp.f32 %v1159_v6  ;;  %v2792_v6 = vld [vmem:[#allocation8 + $0xac] ss:$16 sps:$4 sm:$0xff]  }
 0x449   :  { %v2083_v22 = vpop.eup %2082 }
 0x44a   :  { %v1163_v7 = vmul.f32 %v2083_v22, %v2079_v18  ;;  %v2775_v18 = vld [vmem:[#allocation8 + $0xc4] ss:$16 sps:$4 sm:$0xff]   ;;  %v2783_v22 = vld [vmem:[#allocation8 + $0xc0] ss:$16 sps:$4 sm:$0xff]  }
 0x44b   :  { %v2085_v44 = vpop.eup %2084 }
 0x44c   :  { %v1162_v10 = vmul.f32 %v2085_v44, %v2678_v62  ;;  %v2789_v44 = vld [vmem:[#allocation8 + $0xa4] ss:$16 sps:$4 sm:$0xff]  }
 0x44d   :  { %v2087_v20 = vpop.eup %2086 }
 0x44e   :  { %v2720_v28 = vadd.f32 %v1163_v7, %v1162_v10  ;;  %v2786_v7 = vld [vmem:[#allocation8 + $0xc8] ss:$16 sps:$4 sm:$0xff]   ;;  %v2795_v10 = vld [vmem:[#allocation8 + $0xa0] ss:$16 sps:$4 sm:$0xff]  }
 0x450   :  { %2088 = vtanh.f32 %v2720_v28 }
 0x45d   :  { %v2089_v32 = vpop.eup %2088 }
 0x45e   :  { %v1166_v15 = vmul.f32 %v2089_v32, %v2087_v20  ;;  %v2801_v20 = vld [vmem:[#allocation8 + $0x84] ss:$16 sps:$4 sm:$0xff]   ;;  %v2804_v32 = vld [vmem:[#allocation8 + $0x8c] ss:$16 sps:$4 sm:$0xff]  }
 0x460   :  { %v1174_v8 = vpack.c.bf16 %v1166_v15, %v1166_v15  ;;  %v2807_v15 = vld [vmem:[#allocation8 + $0x80] ss:$16 sps:$4 sm:$0xff]  }
 0x462   :  { %1208 = vmatmul.mubr.bf16.vlgmr.msra.gmra.mxu0 %v1174_v8  ;;  %1249 = vmatmul.mubr.bf16.vlgmr.msra.gmra.mxu1 %v1174_v8  ;;  %v2810_v8 = vld [vmem:[#allocation8 + $0x88] ss:$16 sps:$4 sm:$0xff]  }
 0x463   :  { %1294 = vmatpush1.bf16.msra.mxu0 %v2365_v36  ;;  %1335 = vmatpush1.bf16.msra.mxu1 %v2367_v37  ;;  %v2755_v36 = vld [vmem:[#allocation8 + $0xe4] ss:$16 sps:$4 sm:$0xff]   ;;  %v2758_v37 = vld [vmem:[#allocation8 + $0xec] ss:$16 sps:$4 sm:$0xff]  }
 0x464   :  { %1295 = vmatprep.subr.bf16.mxu0 %v2371_v38  ;;  %1336 = vmatprep.subr.bf16.mxu1 %v2373_v39 }
 0x465   :  { %1325 = vmatprep.mubr.bf16.mxu0 %v2920_v9  ;;  %1366 = vmatprep.mubr.bf16.mxu1 %v2920_v9 }
 0x467   :  { %1296 = vmatpush1.bf16.msra.mxu0 %v2375_v40  ;;  %1337 = vmatpush1.bf16.msra.mxu1 %v2379_v41  ;;  %v2926_v40 = vld [vmem:[#allocation21_spill] sm:$0xff] }
 0x468   :  { %1297 = vmatprep.subr.bf16.mxu0 %v2383_v42  ;;  %1338 = vmatprep.subr.bf16.mxu1 %v2385_v43 }
 0x46b   :  { %1298 = vmatpush1.bf16.msra.mxu0 %v2389_v45  ;;  %1339 = vmatpush1.bf16.msra.mxu1 %v2391_v46  ;;  %v2927_v46 = vld [vmem:[#allocation23_spill] sm:$0xff] }
 0x46c   :  { %1299 = vmatprep.subr.bf16.mxu0 %v2395_v47  ;;  %1340 = vmatprep.subr.bf16.mxu1 %v2399_v48 }
 0x46f   :  { %1300 = vmatpush1.bf16.msra.mxu0 %v2401_v49  ;;  %1341 = vmatpush1.bf16.msra.mxu1 %v2403_v50 }
 0x470   :  { %1301 = vmatprep.subr.bf16.mxu0 %v2407_v51  ;;  %1342 = vmatprep.subr.bf16.mxu1 %v2411_v52 }
 0x473   :  { %1302 = vmatpush1.bf16.msra.mxu0 %v2415_v54  ;;  %1343 = vmatpush1.bf16.msra.mxu1 %v2417_v55  ;;  %v2928_v54 = vld [vmem:[#allocation24_spill] sm:$0xff] }
 0x474   :  { %1303 = vmatprep.subr.bf16.mxu0 %v2419_v56  ;;  %1344 = vmatprep.subr.bf16.mxu1 %v2421_v57  ;;  %v2929_v56 = vld [vmem:[#allocation22_spill] sm:$0xff] }
 0x477   :  { %1304 = vmatpush1.bf16.msra.mxu0 %v2429_v58  ;;  %1345 = vmatpush1.bf16.msra.mxu1 %v2431_v59 }
 0x478   :  { %1305 = vmatprep.subr.bf16.mxu0 %v2435_v60  ;;  %1346 = vmatprep.subr.bf16.mxu1 %v2437_v61 }
 0x47b   :  { %1306 = vmatpush1.bf16.msra.mxu0 %v2443_v63  ;;  %1347 = vmatpush1.bf16.msra.mxu1 %v2445_v1 }
 0x47c   :  { %1307 = vmatprep.subr.bf16.mxu0 %v2449_v2  ;;  %1348 = vmatprep.subr.bf16.mxu1 %v2451_v3 }
 0x47f   :  { %1308 = vmatpush1.bf16.msra.mxu0 %v2455_v4  ;;  %1349 = vmatpush1.bf16.msra.mxu1 %v2457_v5 }
 0x480   :  { %1411 = vmatprep.subr.bf16.mxu0 %v2755_v36  ;;  %1452 = vmatprep.subr.bf16.mxu1 %v2758_v37 }
 0x522   :  { %v1209_v38 = vpop.f32.mrf.mxu0  ;;  %v1250_v39 = vpop.f32.mrf.mxu1 }
 0x523   :  { %v1257_v41 = vadd.f32 %v1209_v38, %v2926_v40  ;;  %v1259_v57 = vadd.f32 %v1250_v39, %v2929_v56  ;;  %v2813_v38 = vld [vmem:[#allocation8 + $0x64] ss:$16 sps:$4 sm:$0xff]   ;;  %v2816_v39 = vld [vmem:[#allocation8 + $0x6c] ss:$16 sps:$4 sm:$0xff]   ;;  %v2819_v40 = vld [vmem:[#allocation8 + $0x60] ss:$16 sps:$4 sm:$0xff]  }
 0x524   :  { %v1211_v42 = vpop.f32.mrf.mxu0  ;;  %v1252_v43 = vpop.f32.mrf.mxu1 }
 0x525   :  { %v1856_v45 = vmul.f32 -1.442695, %v1257_v41  ;;  %v1258_v47 = vadd.f32 %v1211_v42, %v2927_v46  ;;  %v1260_v55 = vadd.f32 %v1252_v43, %v2928_v54  ;;  %v2822_v41 = vld [vmem:[#allocation8 + $0x68] ss:$16 sps:$4 sm:$0xff]   ;;  %v2825_v42 = vld [vmem:[#allocation8 + $0x44] ss:$16 sps:$4 sm:$0xff]  }
 0x526   :  { %v1213_v48 = vpop.f32.mrf.mxu0  ;;  %v1254_v49 = vpop.f32.mrf.mxu1  ;;  %v2828_v43 = vld [vmem:[#allocation8 + $0x4c] ss:$16 sps:$4 sm:$0xff]  }
 0x527   :  { %2090 = vpow2.f32 %v1856_v45  ;;  %v1857_v50 = vmul.f32 -1.442695, %v1258_v47  ;;  %v1858_v62 = vmul.f32 -1.442695, %v1260_v55 }
 0x528   :  { %v1214_v51 = vpop.f32.mrf.mxu0  ;;  %v1255_v52 = vpop.f32.mrf.mxu1 }
 0x529   :  { %2092 = vpow2.f32 %v1857_v50  ;;  %v2933_v50 = vld [vmem:[#allocation26_spill] sm:$0xff] }
 0x52a   :  { %2094 = vtanh.f32 %v1259_v57 }
 0x52b   :  { %2096 = vpow2.f32 %v1858_v62 }
 0x534   :  { %v2091_v26 = vpop.eup %2090 }
 0x535   :  { %v1264_v21 = vadd.f32 1.0, %v2091_v26 }
 0x536   :  { %v2093_v17 = vpop.eup %2092 }
 0x537   :  { %2098 = vrcp.f32 %v1264_v21  ;;  %v1270_v19 = vadd.f32 1.0, %v2093_v17  ;;  %v2095_v23 = vpop.eup %2094 }
 0x538   :  { %v2097_v0 = vpop.eup %2096 }
 0x539   :  { %2100 = vrcp.f32 %v1270_v19  ;;  %v1277_v11 = vadd.f32 1.0, %v2097_v0 }
 0x53b   :  { %2102 = vrcp.f32 %v1277_v11 }
 0x544   :  { %v2099_v27 = vpop.eup %2098 }
 0x545   :  { %v1281_v13 = vmul.f32 %v2099_v27, %v2095_v23 }
 0x546   :  { %v2101_v14 = vpop.eup %2100 }
 0x547   :  { %v1280_v33 = vmul.f32 %v2101_v14, %v2720_v28  ;;  %v2798_v28 = vld [vmem:[#allocation8 + $0xa8] ss:$16 sps:$4 sm:$0xff]  }
 0x548   :  { %v2103_v34 = vpop.eup %2102 }
 0x549   :  { %v2766_v31 = vadd.f32 %v1281_v13, %v1280_v33  ;;  %v2177_v33 = vld [vmem:[#allocation8 + $0x48] ss:$16 sps:$4 sm:$0xff]  }
 0x54b   :  { %2104 = vtanh.f32 %v2766_v31 }
 0x558   :  { %v2105_v12 = vpop.eup %2104 }
 0x559   :  { %v1284_v53 = vmul.f32 %v2105_v12, %v2103_v34  ;;  %v2179_v34 = vld [vmem:[#allocation8 + $0x2c] ss:$16 sps:$4 sm:$0xff]   ;;  %v2180_v12 = vld [vmem:[#allocation8 + $0x20] ss:$16 sps:$4 sm:$0xff]  }
 0x55b   :  { %v1292_v25 = vpack.c.bf16 %v1284_v53, %v1284_v53  ;;  %v2181_v53 = vld [vmem:[#allocation8 + $0x28] ss:$16 sps:$4 sm:$0xff]  }
 0x55d   :  { %1326 = vmatmul.mubr.bf16.vlgmr.msra.gmra.mxu0 %v1292_v25  ;;  %1367 = vmatmul.mubr.bf16.vlgmr.msra.gmra.mxu1 %v1292_v25  ;;  %v2182_v25 = vld [vmem:[#allocation8 + $0x4] ss:$16 sps:$4 sm:$0xff]  }
 0x55e   :  { %1412 = vmatpush1.bf16.msra.mxu0 %v2769_v29  ;;  %1453 = vmatpush1.bf16.msra.mxu1 %v2772_v24 }
 0x55f   :  { %1413 = vmatprep.subr.bf16.mxu0 %v2775_v18  ;;  %1454 = vmatprep.subr.bf16.mxu1 %v2778_v16 }
 0x560   :  { %1443 = vmatprep.mubr.bf16.mxu0 %v2920_v9  ;;  %1484 = vmatprep.mubr.bf16.mxu1 %v2920_v9 }
 0x562   :  { %1414 = vmatpush1.bf16.msra.mxu0 %v2783_v22  ;;  %1455 = vmatpush1.bf16.msra.mxu1 %v2786_v7 }
 0x563   :  { %1415 = vmatprep.subr.bf16.mxu0 %v2789_v44  ;;  %1456 = vmatprep.subr.bf16.mxu1 %v2792_v6 }
 0x566   :  { %1416 = vmatpush1.bf16.msra.mxu0 %v2795_v10  ;;  %1457 = vmatpush1.bf16.msra.mxu1 %v2798_v28 }
 0x567   :  { %1417 = vmatprep.subr.bf16.mxu0 %v2801_v20  ;;  %1458 = vmatprep.subr.bf16.mxu1 %v2804_v32 }
 0x56a   :  { %1418 = vmatpush1.bf16.msra.mxu0 %v2807_v15  ;;  %1459 = vmatpush1.bf16.msra.mxu1 %v2810_v8 }
 0x56b   :  { %1419 = vmatprep.subr.bf16.mxu0 %v2813_v38  ;;  %1460 = vmatprep.subr.bf16.mxu1 %v2816_v39 }
 0x56e   :  { %1420 = vmatpush1.bf16.msra.mxu0 %v2819_v40  ;;  %1461 = vmatpush1.bf16.msra.mxu1 %v2822_v41 }
 0x56f   :  { %1421 = vmatprep.subr.bf16.mxu0 %v2825_v42  ;;  %1462 = vmatprep.subr.bf16.mxu1 %v2828_v43 }
 0x572   :  { %1422 = vmatpush1.bf16.msra.mxu0 %v2429_v58  ;;  %1463 = vmatpush1.bf16.msra.mxu1 %v2431_v59 }
 0x573   :  { %1423 = vmatprep.subr.bf16.mxu0 %v2435_v60  ;;  %1464 = vmatprep.subr.bf16.mxu1 %v2437_v61  ;;  %v2930_v60 = vld [vmem:[#allocation25_spill] sm:$0xff] }
 0x576   :  { %1424 = vmatpush1.bf16.msra.mxu0 %v2443_v63  ;;  %1465 = vmatpush1.bf16.msra.mxu1 %v2445_v1  ;;  %v2931_v1 = vld [vmem:[#allocation27_spill] sm:$0xff] }
 0x577   :  { %1425 = vmatprep.subr.bf16.mxu0 %v2449_v2  ;;  %1466 = vmatprep.subr.bf16.mxu1 %v2451_v3 }
 0x57a   :  { %1426 = vmatpush1.bf16.msra.mxu0 %v2455_v4  ;;  %1467 = vmatpush1.bf16.msra.mxu1 %v2457_v5  ;;  %v2932_v5 = vld [vmem:[#allocation28_spill] sm:$0xff] }
 0x57b   :  { %1529 = vmatprep.subr.bf16.mxu0 %v2755_v36  ;;  %1570 = vmatprep.subr.bf16.mxu1 %v2758_v37 }
 0x61d   :  { %v1327_v58 = vpop.f32.mrf.mxu0  ;;  %v1368_v59 = vpop.f32.mrf.mxu1 }
 0x61e   :  { %v1375_v61 = vadd.f32 %v1327_v58, %v2930_v60  ;;  %v1377_v37 = vadd.f32 %v1368_v59, %v2933_v50 }
 0x61f   :  { %v1329_v45 = vpop.f32.mrf.mxu0  ;;  %v1370_v63 = vpop.f32.mrf.mxu1 }
 0x620   :  { %v1859_v46 = vmul.f32 -1.442695, %v1375_v61  ;;  %v1376_v47 = vadd.f32 %v1329_v45, %v2931_v1  ;;  %v1378_v36 = vadd.f32 %v1370_v63, %v2932_v5 }
 0x621   :  { %v1331_v2 = vpop.f32.mrf.mxu0  ;;  %v1372_v48 = vpop.f32.mrf.mxu1 }
 0x622   :  { %2106 = vpow2.f32 %v1859_v46  ;;  %v1860_v3 = vmul.f32 -1.442695, %v1376_v47  ;;  %v1861_v51 = vmul.f32 -1.442695, %v1378_v36 }
 0x623   :  { %v1332_v4 = vpop.f32.mrf.mxu0  ;;  %v1373_v49 = vpop.f32.mrf.mxu1 }
 0x624   :  { %2108 = vpow2.f32 %v1860_v3 }
 0x625   :  { %2110 = vtanh.f32 %v1377_v37 }
 0x626   :  { %2112 = vpow2.f32 %v1861_v51  ;;  %v2018_v51 = vld [vmem:[#allocation9 + $0x38] sm:$0xff]  }
 0x62f   :  { %v2107_v52 = vpop.eup %2106 }
 0x630   :  { %v1382_v54 = vadd.f32 1.0, %v2107_v52  ;;  %v2303_v52 = vmov 0.0  }
 0x631   :  { %v2109_v55 = vpop.eup %2108 }
 0x632   :  { %2114 = vrcp.f32 %v1382_v54  ;;  %v1388_v56 = vadd.f32 1.0, %v2109_v55  ;;  %v2111_v57 = vpop.eup %2110  ;;  %v2019_v54 = vld [vmem:[#allocation9 + $0x30] sm:$0xff]   ;;  %v2020_v55 = vld [vmem:[#allocation9 + $0x28] sm:$0xff]  }
 0x633   :  { %v2113_v62 = vpop.eup %2112 }
 0x634   :  { %2116 = vrcp.f32 %v1388_v56  ;;  %v1395_v19 = vadd.f32 1.0, %v2113_v62  ;;  %v2021_v56 = vld [vmem:[#allocation9 + $0x20] sm:$0xff]   ;;  %v2023_v62 = vld [vmem:[#allocation9 + $0x10] sm:$0xff]  }
 0x636   :  { %2118 = vrcp.f32 %v1395_v19 }
 0x63f   :  { %v2115_v26 = vpop.eup %2114 }
 0x640   :  { %v1399_v21 = vmul.f32 %v2115_v26, %v2111_v57  ;;  %v2022_v57 = vld [vmem:[#allocation9 + $0x18] sm:$0xff]   ;;  %v2024_v26 = vld [vmem:[#allocation9 + $0x8] sm:$0xff]  }
 0x641   :  { %v2117_v17 = vpop.eup %2116 }
 0x642   :  { %v1398_v23 = vmul.f32 %v2117_v17, %v2766_v31  ;;  %v2178_v31 = vld [vmem:[#allocation8 + $0x24] ss:$16 sps:$4 sm:$0xff]  }
 0x643   :  { %v2119_v27 = vpop.eup %2118 }
 0x644   :  { %v2848_v0 = vadd.f32 %v1399_v21, %v1398_v23  ;;  %v2025_v21 = vld [vmem:[#allocation9] sm:$0xff]   ;;  %v2938_v23 = vld [vmem:[#allocation33_spill] sm:$0xff] }
 0x646   :  { %2120 = vtanh.f32 %v2848_v0 }
 0x653   :  { %v2121_v13 = vpop.eup %2120 }
 0x654   :  { %v1402_v14 = vmul.f32 %v2121_v13, %v2119_v27 }
 0x656   :  { %v1410_v11 = vpack.c.bf16 %v1402_v14, %v1402_v14 }
 0x658   :  { %1444 = vmatmul.mubr.bf16.vlgmr.msra.gmra.mxu0 %v1410_v11  ;;  %1485 = vmatmul.mubr.bf16.vlgmr.msra.gmra.mxu1 %v1410_v11 }
 0x659   :  { %1530 = vmatpush1.bf16.msra.mxu0 %v2769_v29  ;;  %1571 = vmatpush1.bf16.msra.mxu1 %v2772_v24  ;;  %v2183_v29 = vld [vmem:[#allocation8 + $0xc] ss:$16 sps:$4 sm:$0xff]   ;;  %v2184_v24 = vld [vmem:[#allocation8] ss:$16 sps:$4 sm:$0xff]  }
 0x65a   :  { %1531 = vmatprep.subr.bf16.mxu0 %v2775_v18  ;;  %1572 = vmatprep.subr.bf16.mxu1 %v2778_v16  ;;  %v2185_v18 = vld [vmem:[#allocation8 + $0x8] ss:$16 sps:$4 sm:$0xff]  }
 0x65b   :  { %1561 = vmatprep.mubr.bf16.mxu0 %v2920_v9  ;;  %1602 = vmatprep.mubr.bf16.mxu1 %v2920_v9  ;;  %v2176_v9 = vld [vmem:[#allocation8 + $0x40] ss:$16 sps:$4 sm:$0xff]  }
 0x65d   :  { %1532 = vmatpush1.bf16.msra.mxu0 %v2783_v22  ;;  %1573 = vmatpush1.bf16.msra.mxu1 %v2786_v7  ;;  %v2934_v7 = vld [vmem:[#allocation29_spill] sm:$0xff] }
 0x65e   :  { %1533 = vmatprep.subr.bf16.mxu0 %v2789_v44  ;;  %1574 = vmatprep.subr.bf16.mxu1 %v2792_v6 }
 0x661   :  { %1534 = vmatpush1.bf16.msra.mxu0 %v2795_v10  ;;  %1575 = vmatpush1.bf16.msra.mxu1 %v2798_v28 }
 0x662   :  { %1535 = vmatprep.subr.bf16.mxu0 %v2801_v20  ;;  %1576 = vmatprep.subr.bf16.mxu1 %v2804_v32  ;;  %v2935_v20 = vld [vmem:[#allocation31_spill] sm:$0xff] }
 0x665   :  { %1536 = vmatpush1.bf16.msra.mxu0 %v2807_v15  ;;  %1577 = vmatpush1.bf16.msra.mxu1 %v2810_v8 }
 0x666   :  { %1537 = vmatprep.subr.bf16.mxu0 %v2813_v38  ;;  %1578 = vmatprep.subr.bf16.mxu1 %v2816_v39 }
 0x669   :  { %1538 = vmatpush1.bf16.msra.mxu0 %v2819_v40  ;;  %1579 = vmatpush1.bf16.msra.mxu1 %v2822_v41  ;;  %v2936_v41 = vld [vmem:[#allocation32_spill] sm:$0xff] }
 0x66a   :  { %1539 = vmatprep.subr.bf16.mxu0 %v2825_v42  ;;  %1580 = vmatprep.subr.bf16.mxu1 %v2828_v43  ;;  %v2937_v43 = vld [vmem:[#allocation30_spill] sm:$0xff] }
 0x66d   :  { %1540 = vmatpush1.bf16.msra.mxu0 %v2176_v9  ;;  %1581 = vmatpush1.bf16.msra.mxu1 %v2177_v33 }
 0x66e   :  { %1541 = vmatprep.subr.bf16.mxu0 %v2178_v31  ;;  %1582 = vmatprep.subr.bf16.mxu1 %v2179_v34 }
 0x671   :  { %1542 = vmatpush1.bf16.msra.mxu0 %v2180_v12  ;;  %1583 = vmatpush1.bf16.msra.mxu1 %v2181_v53 }
 0x672   :  { %1543 = vmatprep.subr.bf16.mxu0 %v2182_v25  ;;  %1584 = vmatprep.subr.bf16.mxu1 %v2183_v29  ;;  %v2939_v25 = vld [vmem:[#allocation34_spill] sm:$0xff] }
 0x675   :  { %1544 = vmatpush1.bf16.msra.mxu0 %v2184_v24  ;;  %1585 = vmatpush1.bf16.msra.mxu1 %v2185_v18 }
 0x676   :  { %1886 = vmatprep.subr.bf16.mxu0 %v2303_v52 }
 0x718   :  { %v1445_v16 = vpop.f32.mrf.mxu0  ;;  %v1486_v22 = vpop.f32.mrf.mxu1 }
 0x719   :  { %v1493_v44 = vadd.f32 %v1445_v16, %v2934_v7  ;;  %v1495_v58 = vadd.f32 %v1486_v22, %v2937_v43 }
 0x71a   :  { %v1447_v6 = vpop.f32.mrf.mxu0  ;;  %v1488_v10 = vpop.f32.mrf.mxu1 }
 0x71b   :  { %v1862_v28 = vmul.f32 -1.442695, %v1493_v44  ;;  %v1494_v32 = vadd.f32 %v1447_v6, %v2935_v20  ;;  %v1496_v42 = vadd.f32 %v1488_v10, %v2936_v41 }
 0x71c   :  { %v1449_v15 = vpop.f32.mrf.mxu0  ;;  %v1490_v8 = vpop.f32.mrf.mxu1 }
 0x71d   :  { %2122 = vpow2.f32 %v1862_v28  ;;  %v1863_v38 = vmul.f32 -1.442695, %v1494_v32  ;;  %v1864_v59 = vmul.f32 -1.442695, %v1496_v42 }
 0x71e   :  { %v1450_v39 = vpop.f32.mrf.mxu0  ;;  %v1491_v40 = vpop.f32.mrf.mxu1 }
 0x71f   :  { %2124 = vpow2.f32 %v1863_v38  ;;  %v1868_v40 = vld [vmem:[%s2897_s5] ss:$0 sm:$0xff] }
 0x720   :  { %2126 = vtanh.f32 %v1495_v58 }
 0x721   :  { %2128 = vpow2.f32 %v1864_v59 }
 0x72a   :  { %v2123_v60 = vpop.eup %2122 }
 0x72b   :  { %v1500_v61 = vadd.f32 1.0, %v2123_v60 }
 0x72c   :  { %v2125_v45 = vpop.eup %2124 }
 0x72d   :  { %2130 = vrcp.f32 %v1500_v61  ;;  %v1506_v63 = vadd.f32 1.0, %v2125_v45  ;;  %v2127_v46 = vpop.eup %2126 }
 0x72e   :  { %v2129_v1 = vpop.eup %2128 }
 0x72f   :  { %2132 = vrcp.f32 %v1506_v63  ;;  %v1513_v3 = vadd.f32 1.0, %v2129_v1 }
 0x731   :  { %2134 = vrcp.f32 %v1513_v3 }
 0x73a   :  { %v2131_v47 = vpop.eup %2130 }
 0x73b   :  { %v1517_v2 = vmul.f32 %v2131_v47, %v2127_v46 }
 0x73c   :  { %v2133_v48 = vpop.eup %2132 }
 0x73d   :  { %v1516_v4 = vmul.f32 %v2133_v48, %v2848_v0 }
 0x73e   :  { %v2135_v5 = vpop.eup %2134 }
 0x73f   :  { %v2878_v49 = vadd.f32 %v1517_v2, %v1516_v4 }
 0x741   :  { %2136 = vtanh.f32 %v2878_v49 }
 0x74e   :  { %v2137_v36 = vpop.eup %2136 }
 0x74f   :  { %v1520_v50 = vmul.f32 %v2137_v36, %v2135_v5 }
 0x751   :  { %v1528_v37 = vpack.c.bf16 %v1520_v50, %v1520_v50 }
 0x753   :  { %1562 = vmatmul.mubr.bf16.vlgmr.msra.gmra.mxu0 %v1528_v37  ;;  %1603 = vmatmul.mubr.bf16.vlgmr.msra.gmra.mxu1 %v1528_v37 }
 0x754   :  { %1887 = vmatpush3.bf16.msra.mxu0 %v2018_v51  ;;  %1902 = vmatprep.mubr.msk.bf16.mxu0 %vm2304_vm0, %v2303_v52 }
 0x755   :  { %1888 = vmatprep.subr.bf16.mxu0 %v2303_v52 }
 0x758   :  { %1889 = vmatpush3.bf16.msra.mxu0 %v2019_v54 }
 0x759   :  { %1890 = vmatprep.subr.bf16.mxu0 %v2303_v52 }
 0x75c   :  { %1891 = vmatpush3.bf16.msra.mxu0 %v2020_v55 }
 0x75d   :  { %1892 = vmatprep.subr.bf16.mxu0 %v2303_v52 }
 0x760   :  { %1893 = vmatpush3.bf16.msra.mxu0 %v2021_v56 }
 0x761   :  { %1894 = vmatprep.subr.bf16.mxu0 %v2303_v52 }
 0x764   :  { %1895 = vmatpush3.bf16.msra.mxu0 %v2022_v57 }
 0x765   :  { %1896 = vmatprep.subr.bf16.mxu0 %v2303_v52 }
 0x768   :  { %1897 = vmatpush3.bf16.msra.mxu0 %v2023_v62 }
 0x769   :  { %1898 = vmatprep.subr.bf16.mxu0 %v2303_v52 }
 0x76c   :  { %1899 = vmatpush3.bf16.msra.mxu0 %v2024_v26 }
 0x76d   :  { %1900 = vmatprep.subr.bf16.mxu0 %v2303_v52 }
 0x770   :  { %1901 = vmatpush3.bf16.msra.mxu0 %v2025_v21 }
 0x813   :  { %v1563_v17 = vpop.f32.mrf.mxu0  ;;  %v1604_v19 = vpop.f32.mrf.mxu1 }
 0x814   :  { %v1611_v0 = vadd.f32 %v1563_v17, %v2938_v23  ;;  %v1613_v29 = vadd.f32 %v1604_v19, %v2939_v25 }
 0x815   :  { %v1565_v27 = vpop.f32.mrf.mxu0  ;;  %v1606_v13 = vpop.f32.mrf.mxu1 }
 0x816   :  { %v1865_v14 = vmul.f32 -1.442695, %v1611_v0  ;;  %v1612_v11 = vadd.f32 %v1565_v27, %v2584_v30  ;;  %v1614_v53 = vadd.f32 %v1606_v13, %v2587_v35 }
 0x817   :  { %v1567_v9 = vpop.f32.mrf.mxu0  ;;  %v1608_v33 = vpop.f32.mrf.mxu1 }
 0x818   :  { %2138 = vpow2.f32 %v1865_v14  ;;  %v1866_v31 = vmul.f32 -1.442695, %v1612_v11  ;;  %v1867_v24 = vmul.f32 -1.442695, %v1614_v53 }
 0x819   :  { %v1568_v34 = vpop.f32.mrf.mxu0  ;;  %v1609_v12 = vpop.f32.mrf.mxu1 }
 0x81a   :  { %2140 = vpow2.f32 %v1866_v31 }
 0x81b   :  { %2142 = vtanh.f32 %v1613_v29 }
 0x81c   :  { %2144 = vpow2.f32 %v1867_v24 }
 0x825   :  { %v2139_v18 = vpop.eup %2138 }
 0x826   :  { %v1618_v16 = vadd.f32 1.0, %v2139_v18 }
 0x827   :  { %v2141_v22 = vpop.eup %2140 }
 0x828   :  { %2146 = vrcp.f32 %v1618_v16  ;;  %v1624_v7 = vadd.f32 1.0, %v2141_v22  ;;  %v2143_v30 = vpop.eup %2142 }
 0x829   :  { %v2145_v44 = vpop.eup %2144 }
 0x82a   :  { %2148 = vrcp.f32 %v1624_v7  ;;  %v1631_v20 = vadd.f32 1.0, %v2145_v44 }
 0x82c   :  { %2150 = vrcp.f32 %v1631_v20 }
 0x835   :  { %v2147_v6 = vpop.eup %2146 }
 0x836   :  { %v1635_v10 = vmul.f32 %v2147_v6, %v2143_v30 }
 0x837   :  { %v2149_v28 = vpop.eup %2148 }
 0x838   :  { %v1634_v32 = vmul.f32 %v2149_v28, %v2878_v49 }
 0x839   :  { %v2151_v15 = vpop.eup %2150 }
 0x83a   :  { %v1636_v35 = vadd.f32 %v1635_v10, %v1634_v32 }
 0x83c   :  { %2152 = vtanh.f32 %v1636_v35 }
 0x849   :  { %v2153_v8 = vpop.eup %2152 }
 0x84a   :  { %v1638_v38 = vmul.f32 %v2153_v8, %v2151_v15 }
 0x84c   :  { %v1639_v39 = vpack.c.bf16 %v1638_v38, %v1638_v38 }
 0x84e   :  { %1903 = vmatmul.mubr.bf16.vlgmr.msra.gmra.mxu0 %v1639_v39 }
 0x90e   :  { %v1745_v41 = vpop.f32.mrf.mxu0 }
 0x90f   :  { %v1746_v42 = vadd.f32 %v1868_v40, %v1745_v41 }
 0x910   :  { %v1904_v43 = vpop.f32.mrf.mxu0 }
 0x911   :  { %1751 = vst [vmem:[#allocation11] sm:$0xff] %v1746_v42 }
 0x912   :  { %v1748_v58 = vpop.f32.mrf.mxu0 }
 0x913   :  { %2277 = shalt.err (!%p2274_p10)
}
 0x914   :  { %1761 = dma.vmem_to_hbm [thread:$0]  %s1759_s21, 128, %s2898_s6, [#allocation5]   ;;  %v1905_v59 = vpop.f32.mrf.mxu0 }
 0x915   :  { %2292 = dma.done.wait [#allocation5], 128  }
 0x916   :  { %2293 = vsyncadd [#allocation5], 4294967168 }
 0x917   :  { %1765 = vsyncpa [#allocation4], 1 }
 0x918   :  { %1766 = vsyncpa [#allocation7], 1 }
 0x919   :  { %1767 = vsyncpa [#allocation10], 1 }
 0x91a   :  { %1768 = vsyncpa [#allocation5], 1 }

</bundles_post_ra>
